<compile_context>
chip_gen: v5e
topology: v5e:2x2
jax: 0.10.0
libtpu: 0.0.40
codegen_flags: <defaults>
</compile_context>

<pallas_src>
import functools

import jax
import jax.numpy as jnp
from jax.experimental import pallas as pl
from jax.experimental.pallas import tpu as pltpu


def _round_up(x, m):
    return (x + m - 1) // m * m


def _char_cnn_kernel(x_ref, wconv_ref, bconv_ref, whw_ref, bhw_ref, o_ref,
                     *, l_out, e_word):
    """One tile of 2*tile_n words: conv (single matmul) + relu + max-over-time + highway."""
    wconv = wconv_ref[...]        # (Lc_pad, l_out*e_word)  bf16, block-banded
    bconv = bconv_ref[...]        # (1, e_word)             f32
    whw = whw_ref[...]            # (e_word, 2*e_word)      bf16, proj|gate fused
    bhw = bhw_ref[...]            # (1, 2*e_word)           f32

    def embed_half(x):            # x: (tile_n, Lc_pad) bf16
        # Conv1d over ALL time steps as one MXU matmul (f32 accumulation).
        conv = jnp.dot(x, wconv, preferred_element_type=jnp.float32)   # (tile_n, l_out*e_word)
        # Max over time; bias-add and ReLU hoisted out of the loop (equivalent numerics).
        m = conv[:, :e_word]
        for t in range(1, l_out):                                      # small static unroll
            m = jnp.maximum(m, conv[:, t * e_word:(t + 1) * e_word])
        m = jnp.maximum(m + bconv, 0.0)                                 # (tile_n, e_word) f32
        # Highway: fused proj|gate matmul (128-wide), then split lanes.
        hw = jnp.dot(m.astype(whw.dtype), whw,
                     preferred_element_type=jnp.float32) + bhw          # (tile_n, 2*e_word)
        proj = jnp.maximum(hw[:, :e_word], 0.0)
        gate = jax.nn.sigmoid(hw[:, e_word:])
        return gate * proj + (1.0 - gate) * m                           # (tile_n, e_word) f32

    h_lo = embed_half(x_ref[0])
    h_hi = embed_half(x_ref[1])
    # TODO(synk): training-mode Dropout(p=0.3) not implemented; eval mode == identity.
    # Pack two word-halves per output row so the output block (and its HBM
    # writeback) is 2*e_word >= 128 lanes wide.
    o_ref[:, :e_word] = h_lo.astype(o_ref.dtype)
    o_ref[:, e_word:] = h_hi.astype(o_ref.dtype)


def model_embeddings_forward(input_ids, params, *, embed_size, e_char,
                             kernel_size=5, conv_padding=1, tile_n=256):
    """input_ids: (sentence_length, batch_size, max_word_length) int32."""
    sent_len, batch_size, max_word_len = input_ids.shape
    n_words = sent_len * batch_size
    l_pad = max_word_len + 2 * conv_padding
    l_out = l_pad - kernel_size + 1
    lc = l_pad * e_char
    lc_pad = _round_up(lc, 128)            # lane-dense activation width
    n_conv = l_out * embed_size            # conv matmul output width

    # --- glue: char-embedding lookup (pad row of the table is zeros) + conv zero-pad ---
    emb = jnp.take(params["emb_table"], input_ids.reshape(-1), axis=0)
    emb = emb.reshape(n_words, max_word_len, e_char)
    x = jnp.pad(emb, ((0, 0), (conv_padding, conv_padding), (0, 0)))
    x = x.reshape(n_words, lc)             # channels-last, flattened 2-D

    # --- word tiling: two word-halves per output row (lane-dense 2*embed_size output) ---
    n_half = -(-n_words // 2)
    # Clamp the tile so small inputs still work and large inputs keep >=2 grid
    # steps (lets v7x shard the "parallel" axis across its 2 TensorCores).
    tile_n = max(8, min(tile_n, _round_up(-(-n_half // 2), 8)))
    n_half_pad = _round_up(n_half, tile_n)
    n_pad = 2 * n_half_pad
    x = jnp.pad(x, ((0, n_pad - n_words), (0, lc_pad - lc))).astype(jnp.bfloat16)
    x2 = x.reshape(2, n_half_pad, lc_pad)

    # --- glue: fold all conv taps into one block-banded matmul weight ---
    # w_conv (e_word, e_char, K) -> W_big[(t+k)*e_char + ci, t*e_word + co] = w_conv[co, ci, k]
    w_tap = jnp.transpose(params["w_conv"], (2, 1, 0)).reshape(kernel_size * e_char, embed_size)
    w_big = jnp.zeros((lc_pad, n_conv), jnp.float32)
    for t in range(l_out):
        w_big = w_big.at[t * e_char:t * e_char + kernel_size * e_char,
                         t * embed_size:(t + 1) * embed_size].set(w_tap)
    w_big = w_big.astype(jnp.bfloat16)
    b_conv = params["b_conv"].reshape(1, embed_size).astype(jnp.float32)
    # Highway proj|gate fused into a single (e_word, 2*e_word) weight (y = x @ W.T + b).
    w_hw = jnp.concatenate([params["w_proj"].T, params["w_gate"].T], axis=1).astype(jnp.bfloat16)
    b_hw = jnp.concatenate([params["b_proj"], params["b_gate"]]).reshape(1, 2 * embed_size)
    b_hw = b_hw.astype(jnp.float32)

    grid = (n_half_pad // tile_n,)
    kernel = functools.partial(_char_cnn_kernel, l_out=l_out, e_word=embed_size)

    cost = pl.CostEstimate(
        flops=2 * n_pad * (lc_pad * n_conv + embed_size * 2 * embed_size),
        transcendentals=n_pad * embed_size,                     # sigmoid
        bytes_accessed=(n_pad * lc_pad * 2                      # x (bf16)
                        + lc_pad * n_conv * 2                   # conv weight (bf16)
                        + embed_size * 2 * embed_size * 2       # highway weight (bf16)
                        + n_half_pad * 2 * embed_size * 4),     # output (f32)
    )

    out = pl.pallas_call(
        kernel,
        out_shape=jax.ShapeDtypeStruct((n_half_pad, 2 * embed_size), jnp.float32),
        grid_spec=pltpu.PrefetchScalarGridSpec(
            num_scalar_prefetch=0,
            grid=grid,
            in_specs=[
                pl.BlockSpec((2, tile_n, lc_pad), lambda i: (0, i, 0)),
                pl.BlockSpec((lc_pad, n_conv), lambda i: (0, 0)),
                pl.BlockSpec((1, embed_size), lambda i: (0, 0)),
                pl.BlockSpec((embed_size, 2 * embed_size), lambda i: (0, 0)),
                pl.BlockSpec((1, 2 * embed_size), lambda i: (0, 0)),
            ],
            out_specs=pl.BlockSpec((tile_n, 2 * embed_size), lambda i: (i, 0)),
        ),
        compiler_params=pltpu.CompilerParams(
            dimension_semantics=("parallel",),
            vmem_limit_bytes=48 * 1024 * 1024,   # explicit budget with headroom for v7x (64 MiB)
        ),
        cost_estimate=cost,
    )(x2, w_big, b_conv, w_hw, b_hw)

    # Unpack the two word-halves and restore (sentence_length, batch_size, embed_size).
    h = jnp.concatenate([out[:, :embed_size], out[:, embed_size:]], axis=0)[:n_words]
    return h.reshape(sent_len, batch_size, embed_size)


def init_params(key, *, vocab_size, e_char, embed_size, kernel_size=5, pad_idx=0):
    ks = jax.random.split(key, 7)
    emb_table = jax.random.normal(ks[0], (vocab_size, e_char), jnp.float32) * 0.1
    emb_table = emb_table.at[pad_idx].set(0.0)  # nn.Embedding padding_idx row is zeros
    return {
        "emb_table": emb_table,
        "w_conv": jax.random.normal(ks[1], (embed_size, e_char, kernel_size), jnp.float32) * 0.05,
        "b_conv": jax.random.normal(ks[2], (embed_size,), jnp.float32) * 0.05,
        "w_proj": jax.random.normal(ks[3], (embed_size, embed_size), jnp.float32) * 0.05,
        "b_proj": jax.random.normal(ks[4], (embed_size,), jnp.float32) * 0.05,
        "w_gate": jax.random.normal(ks[5], (embed_size, embed_size), jnp.float32) * 0.05,
        "b_gate": jax.random.normal(ks[6], (embed_size,), jnp.float32) * 0.05,
    }


def _reference(input_ids, params, *, embed_size, e_char, kernel_size=5, conv_padding=1,
               matmul_dtype=jnp.float32):
    """Pure-JAX reference of the same forward pass (matmul operands in matmul_dtype)."""
    s, b, mwl = input_ids.shape
    emb = jnp.take(params["emb_table"], input_ids.reshape(-1), axis=0).reshape(-1, mwl, e_char)
    x = jnp.pad(emb, ((0, 0), (conv_padding, conv_padding), (0, 0)))
    l_out = mwl + 2 * conv_padding - kernel_size + 1
    wconv = jnp.transpose(params["w_conv"], (2, 1, 0)).reshape(kernel_size * e_char, embed_size)
    xc = x.astype(matmul_dtype)
    wc = wconv.astype(matmul_dtype)
    conv = jnp.stack(
        [jnp.dot(xc[:, t:t + kernel_size, :].reshape(x.shape[0], -1), wc,
                 preferred_element_type=jnp.float32) for t in range(l_out)], axis=1)
    pooled = jax.nn.relu(jnp.max(conv, axis=1) + params["b_conv"][None, :])
    pm = pooled.astype(matmul_dtype)
    wp = params["w_proj"].T.astype(matmul_dtype)
    wg = params["w_gate"].T.astype(matmul_dtype)
    proj = jax.nn.relu(jnp.dot(pm, wp, preferred_element_type=jnp.float32) + params["b_proj"])
    gate = jax.nn.sigmoid(jnp.dot(pm, wg, preferred_element_type=jnp.float32) + params["b_gate"])
    h = gate * proj + (1.0 - gate) * pooled
    return h.reshape(s, b, embed_size)


if __name__ == "__main__":
    SENT_LEN, BATCH, MAX_WORD_LEN = 4, 2, 8
    VOCAB_SIZE, E_CHAR, EMBED_SIZE = 30, 50, 64
    PAD_IDX = 0

    key = jax.random.PRNGKey(0)
    k_param, k_ids = jax.random.split(key)
    params = init_params(k_param, vocab_size=VOCAB_SIZE, e_char=E_CHAR,
                         embed_size=EMBED_SIZE, pad_idx=PAD_IDX)
    input_ids = jax.random.randint(k_ids, (SENT_LEN, BATCH, MAX_WORD_LEN), 0, VOCAB_SIZE,
                                   dtype=jnp.int32)

    out = model_embeddings_forward(input_ids, params,
                                   embed_size=EMBED_SIZE, e_char=E_CHAR)
    out = jax.block_until_ready(out)
    assert out.shape == (SENT_LEN, BATCH, EMBED_SIZE)

    # Kernel uses bf16 matmul operands (f32 accumulation): compare tightly against a
    # matched-precision reference and loosely against the pure-f32 reference.
    ref_bf16 = _reference(input_ids, params, embed_size=EMBED_SIZE, e_char=E_CHAR,
                          matmul_dtype=jnp.bfloat16)
    ref_f32 = _reference(input_ids, params, embed_size=EMBED_SIZE, e_char=E_CHAR,
                         matmul_dtype=jnp.float32)
    assert jnp.allclose(out, ref_bf16, atol=2e-3, rtol=2e-3), "mismatch vs matched-precision ref"
    assert jnp.allclose(out, ref_f32, atol=3e-2, rtol=3e-2), "mismatch vs f32 reference"

    print("KERNEL_OK")
</pallas_src>

<mosaic_0001>
module attributes {stable_mosaic.version = 11 : i64} {
  func.func @_char_cnn_kernel(%arg0: i32, %arg1: memref<2x8x512xbf16, #tpu.memory_space<vmem>>, %arg2: memref<512x384xbf16, #tpu.memory_space<vmem>>, %arg3: memref<1x64xf32, #tpu.memory_space<vmem>>, %arg4: memref<64x128xbf16, #tpu.memory_space<vmem>>, %arg5: memref<1x128xf32, #tpu.memory_space<vmem>>, %arg6: memref<8x128xf32, #tpu.memory_space<vmem>>) attributes {dimension_semantics = [#tpu.dimension_semantics<parallel>], iteration_bounds = array<i64: 1>, scalar_prefetch = 0 : i64, scratch_operands = 0 : i64, tpu.core_type = #tpu.core_type<tc>, window_params = [{transform_indices = @transform_0, window_bounds = array<i64: 2, 8, 512>}, {pipeline_mode = #tpu.pipeline_mode<synchronous>, transform_indices = @transform_1, window_bounds = array<i64: 512, 384>}, {pipeline_mode = #tpu.pipeline_mode<synchronous>, transform_indices = @transform_2, window_bounds = array<i64: 1, 64>}, {pipeline_mode = #tpu.pipeline_mode<synchronous>, transform_indices = @transform_3, window_bounds = array<i64: 64, 128>}, {pipeline_mode = #tpu.pipeline_mode<synchronous>, transform_indices = @transform_4, window_bounds = array<i64: 1, 128>}, {transform_indices = @transform_5, window_bounds = array<i64: 8, 128>}]} {
    %c0 = arith.constant 0 : index
    %c0_0 = arith.constant 0 : index
    %0 = vector.load %arg2[%c0, %c0_0] : memref<512x384xbf16, #tpu.memory_space<vmem>>, vector<512x384xbf16>
    %c0_1 = arith.constant 0 : index
    %c0_2 = arith.constant 0 : index
    %1 = vector.load %arg3[%c0_1, %c0_2] : memref<1x64xf32, #tpu.memory_space<vmem>>, vector<1x64xf32>
    %c0_3 = arith.constant 0 : index
    %c0_4 = arith.constant 0 : index
    %2 = vector.load %arg4[%c0_3, %c0_4] : memref<64x128xbf16, #tpu.memory_space<vmem>>, vector<64x128xbf16>
    %c0_5 = arith.constant 0 : index
    %c0_6 = arith.constant 0 : index
    %3 = vector.load %arg5[%c0_5, %c0_6] : memref<1x128xf32, #tpu.memory_space<vmem>>, vector<1x128xf32>
    %c0_7 = arith.constant 0 : index
    %c0_8 = arith.constant 0 : index
    %c0_9 = arith.constant 0 : index
    %4 = vector.load %arg1[%c0_7, %c0_8, %c0_9] : memref<2x8x512xbf16, #tpu.memory_space<vmem>>, vector<1x8x512xbf16>
    %5 = vector.shape_cast %4 : vector<1x8x512xbf16> to vector<8x512xbf16>
    %cst = arith.constant dense<0.000000e+00> : vector<8x384xf32>
    %6 = tpu.matmul %5, %0, %cst {dimension_numbers = #tpu.dot_dimension_numbers<[1], [0], [0], [1], [0, 0, 1, 1], [], []>} : vector<8x512xbf16>, vector<512x384xbf16>, vector<8x384xf32> -> vector<8x384xf32>
    %7 = vector.extract_strided_slice %6 {offsets = [0, 0], sizes = [8, 64], strides = [1, 1]} : vector<8x384xf32> to vector<8x64xf32>
    %8 = vector.extract_strided_slice %6 {offsets = [0, 64], sizes = [8, 64], strides = [1, 1]} : vector<8x384xf32> to vector<8x64xf32>
    %9 = arith.maximumf %7, %8 : vector<8x64xf32>
    %10 = vector.extract_strided_slice %6 {offsets = [0, 128], sizes = [8, 64], strides = [1, 1]} : vector<8x384xf32> to vector<8x64xf32>
    %11 = arith.maximumf %9, %10 : vector<8x64xf32>
    %12 = vector.extract_strided_slice %6 {offsets = [0, 192], sizes = [8, 64], strides = [1, 1]} : vector<8x384xf32> to vector<8x64xf32>
    %13 = arith.maximumf %11, %12 : vector<8x64xf32>
    %14 = vector.extract_strided_slice %6 {offsets = [0, 256], sizes = [8, 64], strides = [1, 1]} : vector<8x384xf32> to vector<8x64xf32>
    %15 = arith.maximumf %13, %14 : vector<8x64xf32>
    %16 = vector.extract_strided_slice %6 {offsets = [0, 320], sizes = [8, 64], strides = [1, 1]} : vector<8x384xf32> to vector<8x64xf32>
    %17 = arith.maximumf %15, %16 : vector<8x64xf32>
    %18 = vector.broadcast %1 : vector<1x64xf32> to vector<8x64xf32>
    %19 = arith.addf %17, %18 : vector<8x64xf32>
    %cst_10 = arith.constant 0.000000e+00 : f32
    %20 = vector.broadcast %cst_10 : f32 to vector<8x64xf32>
    %21 = arith.maximumf %19, %20 : vector<8x64xf32>
    %22 = arith.truncf %21 : vector<8x64xf32> to vector<8x64xbf16>
    %cst_11 = arith.constant dense<0.000000e+00> : vector<8x128xf32>
    %23 = tpu.matmul %22, %2, %cst_11 {dimension_numbers = #tpu.dot_dimension_numbers<[1], [0], [0], [1], [0, 0, 1, 1], [], []>} : vector<8x64xbf16>, vector<64x128xbf16>, vector<8x128xf32> -> vector<8x128xf32>
    %24 = vector.broadcast %3 : vector<1x128xf32> to vector<8x128xf32>
    %25 = arith.addf %23, %24 : vector<8x128xf32>
    %26 = vector.extract_strided_slice %25 {offsets = [0, 0], sizes = [8, 64], strides = [1, 1]} : vector<8x128xf32> to vector<8x64xf32>
    %cst_12 = arith.constant 0.000000e+00 : f32
    %27 = vector.broadcast %cst_12 : f32 to vector<8x64xf32>
    %28 = arith.maximumf %26, %27 : vector<8x64xf32>
    %29 = vector.extract_strided_slice %25 {offsets = [0, 64], sizes = [8, 64], strides = [1, 1]} : vector<8x128xf32> to vector<8x64xf32>
    %30 = arith.negf %29 : vector<8x64xf32>
    %31 = math.exp %30 : vector<8x64xf32>
    %cst_13 = arith.constant 1.000000e+00 : f32
    %32 = vector.broadcast %cst_13 : f32 to vector<8x64xf32>
    %33 = arith.addf %32, %31 : vector<8x64xf32>
    %34 = arith.divf %32, %33 : vector<8x64xf32>
    %35 = arith.mulf %34, %28 : vector<8x64xf32>
    %cst_14 = arith.constant 1.000000e+00 : f32
    %36 = vector.broadcast %cst_14 : f32 to vector<8x64xf32>
    %37 = arith.subf %36, %34 : vector<8x64xf32>
    %38 = arith.mulf %37, %21 : vector<8x64xf32>
    %39 = arith.addf %35, %38 : vector<8x64xf32>
    %c1 = arith.constant 1 : index
    %c0_15 = arith.constant 0 : index
    %c0_16 = arith.constant 0 : index
    %40 = vector.load %arg1[%c1, %c0_15, %c0_16] : memref<2x8x512xbf16, #tpu.memory_space<vmem>>, vector<1x8x512xbf16>
    %41 = vector.shape_cast %40 : vector<1x8x512xbf16> to vector<8x512xbf16>
    %cst_17 = arith.constant dense<0.000000e+00> : vector<8x384xf32>
    %42 = tpu.matmul %41, %0, %cst_17 {dimension_numbers = #tpu.dot_dimension_numbers<[1], [0], [0], [1], [0, 0, 1, 1], [], []>} : vector<8x512xbf16>, vector<512x384xbf16>, vector<8x384xf32> -> vector<8x384xf32>
    %43 = vector.extract_strided_slice %42 {offsets = [0, 0], sizes = [8, 64], strides = [1, 1]} : vector<8x384xf32> to vector<8x64xf32>
    %44 = vector.extract_strided_slice %42 {offsets = [0, 64], sizes = [8, 64], strides = [1, 1]} : vector<8x384xf32> to vector<8x64xf32>
    %45 = arith.maximumf %43, %44 : vector<8x64xf32>
    %46 = vector.extract_strided_slice %42 {offsets = [0, 128], sizes = [8, 64], strides = [1, 1]} : vector<8x384xf32> to vector<8x64xf32>
    %47 = arith.maximumf %45, %46 : vector<8x64xf32>
    %48 = vector.extract_strided_slice %42 {offsets = [0, 192], sizes = [8, 64], strides = [1, 1]} : vector<8x384xf32> to vector<8x64xf32>
    %49 = arith.maximumf %47, %48 : vector<8x64xf32>
    %50 = vector.extract_strided_slice %42 {offsets = [0, 256], sizes = [8, 64], strides = [1, 1]} : vector<8x384xf32> to vector<8x64xf32>
    %51 = arith.maximumf %49, %50 : vector<8x64xf32>
    %52 = vector.extract_strided_slice %42 {offsets = [0, 320], sizes = [8, 64], strides = [1, 1]} : vector<8x384xf32> to vector<8x64xf32>
    %53 = arith.maximumf %51, %52 : vector<8x64xf32>
    %54 = vector.broadcast %1 : vector<1x64xf32> to vector<8x64xf32>
    %55 = arith.addf %53, %54 : vector<8x64xf32>
    %cst_18 = arith.constant 0.000000e+00 : f32
    %56 = vector.broadcast %cst_18 : f32 to vector<8x64xf32>
    %57 = arith.maximumf %55, %56 : vector<8x64xf32>
    %58 = arith.truncf %57 : vector<8x64xf32> to vector<8x64xbf16>
    %cst_19 = arith.constant dense<0.000000e+00> : vector<8x128xf32>
    %59 = tpu.matmul %58, %2, %cst_19 {dimension_numbers = #tpu.dot_dimension_numbers<[1], [0], [0], [1], [0, 0, 1, 1], [], []>} : vector<8x64xbf16>, vector<64x128xbf16>, vector<8x128xf32> -> vector<8x128xf32>
    %60 = vector.broadcast %3 : vector<1x128xf32> to vector<8x128xf32>
    %61 = arith.addf %59, %60 : vector<8x128xf32>
    %62 = vector.extract_strided_slice %61 {offsets = [0, 0], sizes = [8, 64], strides = [1, 1]} : vector<8x128xf32> to vector<8x64xf32>
    %cst_20 = arith.constant 0.000000e+00 : f32
    %63 = vector.broadcast %cst_20 : f32 to vector<8x64xf32>
    %64 = arith.maximumf %62, %63 : vector<8x64xf32>
    %65 = vector.extract_strided_slice %61 {offsets = [0, 64], sizes = [8, 64], strides = [1, 1]} : vector<8x128xf32> to vector<8x64xf32>
    %66 = arith.negf %65 : vector<8x64xf32>
    %67 = math.exp %66 : vector<8x64xf32>
    %cst_21 = arith.constant 1.000000e+00 : f32
    %68 = vector.broadcast %cst_21 : f32 to vector<8x64xf32>
    %69 = arith.addf %68, %67 : vector<8x64xf32>
    %70 = arith.divf %68, %69 : vector<8x64xf32>
    %71 = arith.mulf %70, %64 : vector<8x64xf32>
    %cst_22 = arith.constant 1.000000e+00 : f32
    %72 = vector.broadcast %cst_22 : f32 to vector<8x64xf32>
    %73 = arith.subf %72, %70 : vector<8x64xf32>
    %74 = arith.mulf %73, %57 : vector<8x64xf32>
    %75 = arith.addf %71, %74 : vector<8x64xf32>
    %c0_23 = arith.constant 0 : index
    %c0_24 = arith.constant 0 : index
    %76 = vector.load %arg6[%c0_23, %c0_24] : memref<8x128xf32, #tpu.memory_space<vmem>>, vector<8x64xf32>
    tpu.vector_store %arg6[%c0_23, %c0_24], %39 {strides = array<i32>} : memref<8x128xf32, #tpu.memory_space<vmem>>, vector<8x64xf32>,
    %c0_25 = arith.constant 0 : index
    %c64 = arith.constant 64 : index
    %77 = vector.load %arg6[%c0_25, %c64] : memref<8x128xf32, #tpu.memory_space<vmem>>, vector<8x64xf32>
    tpu.vector_store %arg6[%c0_25, %c64], %75 {strides = array<i32>} : memref<8x128xf32, #tpu.memory_space<vmem>>, vector<8x64xf32>,
    return
  }
  func.func @transform_0(%arg0: i32) -> (i32, i32, i32) {
    %c0_i32 = arith.constant 0 : i32
    %c0_i32_0 = arith.constant 0 : i32
    %c0_i32_1 = arith.constant 0 : i32
    return %c0_i32, %arg0, %c0_i32_0 : i32, i32, i32
  }
  func.func @transform_1(%arg0: i32) -> (i32, i32) {
    %c0_i32 = arith.constant 0 : i32
    %c0_i32_0 = arith.constant 0 : i32
    %c0_i32_1 = arith.constant 0 : i32
    return %c0_i32, %c0_i32_0 : i32, i32
  }
  func.func @transform_2(%arg0: i32) -> (i32, i32) {
    %c0_i32 = arith.constant 0 : i32
    %c0_i32_0 = arith.constant 0 : i32
    %c0_i32_1 = arith.constant 0 : i32
    return %c0_i32, %c0_i32_0 : i32, i32
  }
  func.func @transform_3(%arg0: i32) -> (i32, i32) {
    %c0_i32 = arith.constant 0 : i32
    %c0_i32_0 = arith.constant 0 : i32
    %c0_i32_1 = arith.constant 0 : i32
    return %c0_i32, %c0_i32_0 : i32, i32
  }
  func.func @transform_4(%arg0: i32) -> (i32, i32) {
    %c0_i32 = arith.constant 0 : i32
    %c0_i32_0 = arith.constant 0 : i32
    %c0_i32_1 = arith.constant 0 : i32
    return %c0_i32, %c0_i32_0 : i32, i32
  }
  func.func @transform_5(%arg0: i32) -> (i32, i32) {
    %c0_i32 = arith.constant 0 : i32
    %c0_i32_0 = arith.constant 0 : i32
    return %arg0, %c0_i32 : i32, i32
  }
}

</mosaic_0001>

<bundles_post_ra>
// kernel: tpu_custom_call.1
= control target key start
LH: loop header
LB: loop body
LE: loop exit
PB: predicated region body
PF: predicated region fallthrough
CT: control target
= control target key end

     0   :  { %10 = vsyncpa [#allocation3], 0  ;;  %s2393_s0 = inlined_call_operand.hbm [shape: bf16[2,8,512], index: 0, kind: input, shape index: {}]   ;;  %s2394_s1 = inlined_call_operand.hbm [shape: bf16[512,384], index: 1, kind: input, shape index: {}]   ;;  %s2395_s2 = inlined_call_operand.vmem [shape: f32[1,64], index: 2, kind: input, shape index: {}]   ;;  %s2396_s3 = inlined_call_operand.hbm [shape: bf16[64,128], index: 3, kind: input, shape index: {}]   ;;  %s2397_s4 = inlined_call_operand.vmem [shape: f32[1,128], index: 4, kind: input, shape index: {}]   ;;  %s2398_s5 = inlined_call_operand.hbm [shape: f32[8,128], index: 5, kind: output, shape index: {}]  }
   0x1   :  { %11 = vsyncpa [#allocation6], 0  ;;  %s30_s20 = sshll.u32 %s2394_s1, 4  ;;  %s31_s20 = int_to_ptr.hbm [resolvable:$true] %s30_s20 }
   0x2   :  { %12 = vsyncpa [#allocation4], 0  ;;  %s1882_s21 = smov [#allocation5]   ;;  %s17_s25 = sshll.u32 %s2393_s0, 4  ;;  %s18_s25 = int_to_ptr.hbm [resolvable:$true] %s17_s25 }
   0x3   :  { %s32_s22 = sshll.u32 %s1882_s21, 4  ;;  %s1883_s26 = smov 192   ;;  %s33_s22 = int_to_ptr.vmem [resolvable:$true] %s32_s22 }
   0x4   :  { %s1884_s27 = smov 12   ;;  %s1885_s28 = smov [#allocation2]  }
   0x5   :  { %38 = dma.hbm_to_vmem [thread:$0]  %s31_s20, 12288, %s33_s22, [#allocation6], %s1883_s26, %s1883_s26, %s1884_s27  }
   0x6   :  { %s19_s29 = sshll.u32 %s1885_s28, 4  ;;  %s1886_s30 = smov 256   ;;  %s20_s29 = int_to_ptr.vmem [resolvable:$true] %s19_s29 }
   0x7   :  { %s1887_s6 = smov 16   ;;  %s45_s8 = sshll.u32 %s2396_s3, 4  ;;  %s46_s8 = int_to_ptr.hbm [resolvable:$true] %s45_s8 }
   0x8   :  { %25 = dma.hbm_to_vmem [thread:$0]  %s18_s25, 512, %s20_s29, [#allocation3], %s1886_s30, %s1886_s30, %s1887_s6  }
   0x9   :  { %s1888_s9 = smov [#allocation7]   ;;  %s1889_s11 = smov 64  }
   0xa   :  { %s47_s10 = sshll.u32 %s1888_s9, 4  ;;  %s1890_s0 = smov 4   ;;  %s48_s10 = int_to_ptr.vmem [resolvable:$true] %s47_s10 }
   0xb   :  { %53 = dma.hbm_to_vmem [thread:$0]  %s46_s8, 512, %s48_s10, [#allocation6], %s1889_s11, %s1889_s11, %s1890_s0  }
   0xc   :  { %1876 = dma.done.wait [#allocation3], 512  }
   0xd   :  { %1877 = vsyncadd [#allocation3], 4294966784 }
   0xe   :  { %1878 = dma.done.wait [#allocation6], 12800  }
   0xf   :  { %1879 = vsyncadd [#allocation6], 4294954496  ;;  %v1342_v0 = vld [vmem:[#allocation5 + $0xa8] sm:$0xf]  ;;  %v1682_v1 = vld [vmem:[#allocation5 + $0xb0] sm:$0xf0] }
  0x10   :  { %v1438_v2 = vld [vmem:[#allocation5 + $0x168] sm:$0xf]  ;;  %v1933_v3 = vor.u32 %v1682_v1, %v1342_v0  ;;  %v1706_v4 = vld [vmem:[#allocation5 + $0x170] sm:$0xf0]  ;;  %v1330_v11 = vld [vmem:[#allocation5 + $0x90] sm:$0xf] }
  0x11   :  { %v1534_v5 = vld [vmem:[#allocation5 + $0x228] sm:$0xf]  ;;  %v1730_v6 = vld [vmem:[#allocation5 + $0x230] sm:$0xf0]  ;;  %v1935_v7 = vor.u32 %v1706_v4, %v1438_v2  ;;  %v1679_v13 = vld [vmem:[#allocation5 + $0x98] sm:$0xf0] }
  0x12   :  { %v1937_v8 = vor.u32 %v1730_v6, %v1534_v5  ;;  %v1630_v9 = vld [vmem:[#allocation5 + $0x2e8] sm:$0xf]  ;;  %v1754_v10 = vld [vmem:[#allocation5 + $0x2f0] sm:$0xf0]  ;;  %735 = vmatpush.bf16.msra.mxu0 %v1933_v3  ;;  %v1426_v14 = vld [vmem:[#allocation5 + $0x150] sm:$0xf]  ;;  %v1944_v16 = vor.u32 %v1679_v13, %v1330_v11 }
  0x13   :  { %v1940_v12 = vor.u32 %v1754_v10, %v1630_v9  ;;  %v1703_v15 = vld [vmem:[#allocation5 + $0x158] sm:$0xf0]  ;;  %748 = vmatpush.bf16.msra.mxu1 %v1935_v7  ;;  %v1522_v18 = vld [vmem:[#allocation5 + $0x210] sm:$0xf]  ;;  %v1318_v23 = vld [vmem:[#allocation5 + $0x78] sm:$0xf] }
  0x14   :  { %761 = vmatpush.bf16.msra.mxu2 %v1937_v8  ;;  %v1946_v17 = vor.u32 %v1703_v15, %v1426_v14  ;;  %v1727_v19 = vld [vmem:[#allocation5 + $0x218] sm:$0xf0]  ;;  %v1618_v20 = vld [vmem:[#allocation5 + $0x2d0] sm:$0xf]  ;;  %v1676_v24 = vld [vmem:[#allocation5 + $0x80] sm:$0xf0] }
  0x15   :  { %2446 = vst [vmem:[#allocation12_spill] sm:$0xff] %v1940_v12  ;;  %774 = vmatpush.bf16.msra.mxu3 %v1940_v12  ;;  %v1949_v21 = vor.u32 %v1727_v19, %v1522_v18  ;;  %v1751_v22 = vld [vmem:[#allocation5 + $0x2d8] sm:$0xf0]  ;;  %v1414_v26 = vld [vmem:[#allocation5 + $0x138] sm:$0xf]  ;;  %v1954_v29 = vor.u32 %v1676_v24, %v1318_v23  ;;  %vm941_vm0 = vcmask 523264  }
  0x16   :  { %v1951_v25 = vor.u32 %v1751_v22, %v1618_v20  ;;  %v1700_v27 = vld [vmem:[#allocation5 + $0x140] sm:$0xf0]  ;;  %v1510_v28 = vld [vmem:[#allocation5 + $0x1f8] sm:$0xf]  ;;  %736 = vmatpush.bf16.msra.mxu0 %v1944_v16  ;;  %v1306_v35 = vld [vmem:[#allocation5 + $0x60] sm:$0xf] }
  0x17   :  { %v1724_v30 = vld [vmem:[#allocation5 + $0x200] sm:$0xf0]  ;;  %v1606_v31 = vld [vmem:[#allocation5 + $0x2b8] sm:$0xf]  ;;  %749 = vmatpush.bf16.msra.mxu1 %v1946_v17  ;;  %v1958_v33 = vor.u32 %v1700_v27, %v1414_v26  ;;  %v1673_v36 = vld [vmem:[#allocation5 + $0x68] sm:$0xf0] }
  0x18   :  { %2447 = vst [vmem:[#allocation13_spill] sm:$0xff] %v1951_v25  ;;  %v1748_v32 = vld [vmem:[#allocation5 + $0x2c0] sm:$0xf0]  ;;  %762 = vmatpush.bf16.msra.mxu2 %v1949_v21  ;;  %v1960_v34 = vor.u32 %v1724_v30, %v1510_v28  ;;  %v1402_v37 = vld [vmem:[#allocation5 + $0x120] sm:$0xf]  ;;  %v1966_v44 = vor.u32 %v1673_v36, %v1306_v35  ;;  %v208_v36 = vld [vmem:[#allocation2 + $0x8] sm:$0xff] }
  0x19   :  { %775 = vmatpush.bf16.msra.mxu3 %v1951_v25  ;;  %v1963_v38 = vor.u32 %v1748_v32, %v1606_v31  ;;  %v1697_v39 = vld [vmem:[#allocation5 + $0x128] sm:$0xf0]  ;;  %v1498_v40 = vld [vmem:[#allocation5 + $0x1e0] sm:$0xf]  ;;  %v1294_v47 = vld [vmem:[#allocation5 + $0x48] sm:$0xf] }
  0x1a   :  { %v1721_v41 = vld [vmem:[#allocation5 + $0x1e8] sm:$0xf0]  ;;  %v1594_v42 = vld [vmem:[#allocation5 + $0x2a0] sm:$0xf]  ;;  %737 = vmatpush.bf16.msra.mxu0 %v1954_v29  ;;  %v1970_v45 = vor.u32 %v1697_v39, %v1402_v37  ;;  %v1670_v48 = vld [vmem:[#allocation5 + $0x50] sm:$0xf0] }
  0x1b   :  { %2448 = vst [vmem:[#allocation14_spill] sm:$0xff] %v1963_v38  ;;  %v1745_v43 = vld [vmem:[#allocation5 + $0x2a8] sm:$0xf0]  ;;  %750 = vmatpush.bf16.msra.mxu1 %v1958_v33  ;;  %v1972_v46 = vor.u32 %v1721_v41, %v1498_v40  ;;  %v1390_v49 = vld [vmem:[#allocation5 + $0x108] sm:$0xf]  ;;  %v1978_v56 = vor.u32 %v1670_v48, %v1294_v47  ;;  %s1245_s17 = sshll.u32 %s2398_s5, 4  ;;  %s1246_s17 = int_to_ptr.hbm [resolvable:$true] %s1245_s17 }
  0x1c   :  { %763 = vmatpush.bf16.msra.mxu2 %v1960_v34  ;;  %v1975_v50 = vor.u32 %v1745_v43, %v1594_v42  ;;  %v1694_v51 = vld [vmem:[#allocation5 + $0x110] sm:$0xf0]  ;;  %v1486_v52 = vld [vmem:[#allocation5 + $0x1c8] sm:$0xf]  ;;  %v1282_v59 = vld [vmem:[#allocation5 + $0x30] sm:$0xf] }
  0x1d   :  { %776 = vmatpush.bf16.msra.mxu3 %v1963_v38  ;;  %v1718_v53 = vld [vmem:[#allocation5 + $0x1d0] sm:$0xf0]  ;;  %v1582_v54 = vld [vmem:[#allocation5 + $0x288] sm:$0xf]  ;;  %v1982_v57 = vor.u32 %v1694_v51, %v1390_v49  ;;  %v1667_v60 = vld [vmem:[#allocation5 + $0x38] sm:$0xf0] }
  0x1e   :  { %2449 = vst [vmem:[#allocation15_spill] sm:$0xff] %v1975_v50  ;;  %v1742_v55 = vld [vmem:[#allocation5 + $0x290] sm:$0xf0]  ;;  %738 = vmatpush.bf16.msra.mxu0 %v1966_v44  ;;  %v1984_v58 = vor.u32 %v1718_v53, %v1486_v52  ;;  %v1378_v61 = vld [vmem:[#allocation5 + $0xf0] sm:$0xf]  ;;  %v1990_v5 = vor.u32 %v1667_v60, %v1282_v59  ;;  %v213_v52 = vunpack.c.l.b16 %v208_v36  ;;  %v207_v53 = vld [vmem:[#allocation2] sm:$0xff] }
  0x1f   :  { %751 = vmatpush.bf16.msra.mxu1 %v1970_v45  ;;  %v1987_v62 = vor.u32 %v1742_v55, %v1582_v54  ;;  %v1691_v63 = vld [vmem:[#allocation5 + $0xf8] sm:$0xf0]  ;;  %v1474_v0 = vld [vmem:[#allocation5 + $0x1b0] sm:$0xf]  ;;  %v1270_v10 = vld [vmem:[#allocation5 + $0x18] sm:$0xf] }
  0x20   :  { %764 = vmatpush.bf16.msra.mxu2 %v1972_v46  ;;  %v1715_v1 = vld [vmem:[#allocation5 + $0x1b8] sm:$0xf0]  ;;  %v1570_v2 = vld [vmem:[#allocation5 + $0x270] sm:$0xf]  ;;  %v1994_v6 = vor.u32 %v1691_v63, %v1378_v61  ;;  %v1664_v11 = vld [vmem:[#allocation5 + $0x20] sm:$0xf0]  ;;  %v214_v61 = vunpack.c.h.b16 %v208_v36  ;;  %v211_v63 = vunpack.c.l.b16 %v207_v53 }
  0x21   :  { %777 = vmatpush.bf16.msra.mxu3 %v1975_v50  ;;  %2450 = vst [vmem:[#allocation16_spill] sm:$0xff] %v1987_v62  ;;  %v1739_v4 = vld [vmem:[#allocation5 + $0x278] sm:$0xf0]  ;;  %v1996_v9 = vor.u32 %v1715_v1, %v1474_v0  ;;  %v1366_v13 = vld [vmem:[#allocation5 + $0xd8] sm:$0xf]  ;;  %v2002_v24 = vor.u32 %v1664_v11, %v1270_v10  ;;  %vm1236_vm9 = vcmask 1048064  }
  0x22   :  { %739 = vmatpush.bf16.msra.mxu0 %v1978_v56  ;;  %v1999_v14 = vor.u32 %v1739_v4, %v1570_v2  ;;  %v1688_v15 = vld [vmem:[#allocation5 + $0xe0] sm:$0xf0]  ;;  %v1462_v18 = vld [vmem:[#allocation5 + $0x198] sm:$0xf]  ;;  %v1258_v23 = vld [vmem:[#allocation5] sm:$0xf]  ;;  %v212_v2 = vunpack.c.h.b16 %v207_v53 }
  0x23   :  { %752 = vmatpush.bf16.msra.mxu1 %v1982_v57  ;;  %v1712_v19 = vld [vmem:[#allocation5 + $0x1a0] sm:$0xf0]  ;;  %v1558_v20 = vld [vmem:[#allocation5 + $0x258] sm:$0xf]  ;;  %v1661_v26 = vld [vmem:[#allocation5 + $0x8] sm:$0xf0]  ;;  %v2006_v30 = vor.u32 %v1688_v15, %v1366_v13 }
  0x24   :  { %765 = vmatpush.bf16.msra.mxu2 %v1984_v58  ;;  %2451 = vst [vmem:[#allocation17_spill] sm:$0xff] %v1999_v14  ;;  %v1736_v22 = vld [vmem:[#allocation5 + $0x260] sm:$0xf0]  ;;  %v1354_v27 = vld [vmem:[#allocation5 + $0xc0] sm:$0xf]  ;;  %v2008_v31 = vor.u32 %v1712_v19, %v1462_v18  ;;  %v2014_v48 = vor.u32 %v1661_v26, %v1258_v23  ;;  %v2034_v19 = vpack.c.b16 %v213_v52, %v213_v52 }
  0x25   :  { %778 = vmatpush.bf16.msra.mxu3 %v1987_v62  ;;  %v1685_v28 = vld [vmem:[#allocation5 + $0xc8] sm:$0xf0]  ;;  %v1450_v32 = vld [vmem:[#allocation5 + $0x180] sm:$0xf]  ;;  %v2011_v37 = vor.u32 %v1736_v22, %v1558_v20  ;;  %v1344_v42 = vld [vmem:[#allocation5 + $0xb4] sm:$0xf0]  ;;  %v2038_v26 = vpack.c.b16 %v214_v61, %v214_v61  ;;  %v2046_v36 = vpack.c.b16 %v212_v2, %v212_v2 }
  0x26   :  { %740 = vmatpush.bf16.msra.mxu0 %v1990_v5  ;;  %v1709_v35 = vld [vmem:[#allocation5 + $0x188] sm:$0xf0]  ;;  %v1546_v39 = vld [vmem:[#allocation5 + $0x240] sm:$0xf]  ;;  %v1440_v47 = vld [vmem:[#allocation5 + $0x174] sm:$0xf0]  ;;  %v2018_v54 = vor.u32 %v1685_v28, %v1354_v27 }
  0x27   :  { %753 = vmatpush.bf16.msra.mxu1 %v1994_v6  ;;  %2452 = vst [vmem:[#allocation18_spill] sm:$0xff] %v2011_v37  ;;  %v1733_v40 = vld [vmem:[#allocation5 + $0x248] sm:$0xf0]  ;;  %v1536_v51 = vld [vmem:[#allocation5 + $0x234] sm:$0xf0]  ;;  %v2020_v55 = vor.u32 %v1709_v35, %v1450_v32  ;;  %v2040_v32 = vpack.c.b16 %v211_v63, %v211_v63 }
  0x28   :  { %766 = vmatpush.bf16.msra.mxu2 %v1996_v9  ;;  %v1681_v41 = vld [vmem:[#allocation5 + $0xac] sm:$0xf]  ;;  %v1632_v60 = vld [vmem:[#allocation5 + $0x2f4] sm:$0xf0]  ;;  %v2023_v0 = vor.u32 %v1733_v40, %v1546_v39  ;;  %v1678_v11 = vld [vmem:[#allocation5 + $0x94] sm:$0xf] }
  0x29   :  { %779 = vmatpush.bf16.msra.mxu3 %v1999_v14  ;;  %v1705_v43 = vld [vmem:[#allocation5 + $0x16c] sm:$0xf]  ;;  %v2025_v1 = vor.u32 %v1681_v41, %v1344_v42  ;;  %v1332_v13 = vld [vmem:[#allocation5 + $0x9c] sm:$0xf0]  ;;  %v1702_v15 = vld [vmem:[#allocation5 + $0x154] sm:$0xf] }
  0x2a   :  { %741 = vmatpush.bf16.msra.mxu0 %v2002_v24  ;;  %v1729_v49 = vld [vmem:[#allocation5 + $0x22c] sm:$0xf]  ;;  %2453 = vst [vmem:[#allocation19_spill] sm:$0xff] %v2023_v0  ;;  %v2027_v4 = vor.u32 %v1705_v43, %v1440_v47  ;;  %v1428_v20 = vld [vmem:[#allocation5 + $0x15c] sm:$0xf0]  ;;  %v2044_v35 = vor.u32 %v1678_v11, %v1332_v13 }
  0x2b   :  { %754 = vmatpush.bf16.msra.mxu1 %v2006_v30  ;;  %v1753_v59 = vld [vmem:[#allocation5 + $0x2ec] sm:$0xf]  ;;  %v2029_v10 = vor.u32 %v1729_v49, %v1536_v51  ;;  %v1726_v22 = vld [vmem:[#allocation5 + $0x214] sm:$0xf]  ;;  %v1524_v23 = vld [vmem:[#allocation5 + $0x21c] sm:$0xf0]  ;;  %v2050_v39 = vor.u32 %v1702_v15, %v1428_v20 }
  0x2c   :  { %767 = vmatpush.bf16.msra.mxu2 %v2008_v31  ;;  %v2032_v18 = vor.u32 %v1753_v59, %v1632_v60  ;;  %v1750_v27 = vld [vmem:[#allocation5 + $0x2d4] sm:$0xf]  ;;  %v1620_v28 = vld [vmem:[#allocation5 + $0x2dc] sm:$0xf0]  ;;  %v2052_v40 = vor.u32 %v1726_v22, %v1524_v23  ;;  %v1675_v41 = vld [vmem:[#allocation5 + $0x7c] sm:$0xf] }
  0x2d   :  { %780 = vmatpush.bf16.msra.mxu3 %v2011_v37  ;;  %v1320_v42 = vld [vmem:[#allocation5 + $0x84] sm:$0xf0]  ;;  %v1699_v43 = vld [vmem:[#allocation5 + $0x13c] sm:$0xf]  ;;  %v2056_v47 = vor.u32 %v1750_v27, %v1620_v28  ;;  %v1672_v2 = vld [vmem:[#allocation5 + $0x64] sm:$0xf] }
  0x2e   :  { %742 = vmatpush.bf16.msra.mxu0 %v2014_v48  ;;  %2454 = vst [vmem:[#allocation20_spill] sm:$0xff] %v2032_v18  ;;  %v1416_v49 = vld [vmem:[#allocation5 + $0x144] sm:$0xf0]  ;;  %v1723_v51 = vld [vmem:[#allocation5 + $0x1fc] sm:$0xf]  ;;  %v2062_v60 = vor.u32 %v1675_v41, %v1320_v42 }
  0x2f   :  { %755 = vmatpush.bf16.msra.mxu1 %v2018_v54  ;;  %2455 = vst [vmem:[#allocation21_spill] sm:$0xff] %v2056_v47  ;;  %v1512_v52 = vld [vmem:[#allocation5 + $0x204] sm:$0xf0]  ;;  %v1747_v53 = vld [vmem:[#allocation5 + $0x2bc] sm:$0xf]  ;;  %v2066_v61 = vor.u32 %v1699_v43, %v1416_v49 }
  0x30   :  { %768 = vmatpush.bf16.msra.mxu2 %v2020_v55  ;;  %v1608_v59 = vld [vmem:[#allocation5 + $0x2c4] sm:$0xf0]  ;;  %v2068_v63 = vor.u32 %v1723_v51, %v1512_v52  ;;  %v1308_v11 = vld [vmem:[#allocation5 + $0x6c] sm:$0xf0]  ;;  %v1696_v13 = vld [vmem:[#allocation5 + $0x124] sm:$0xf] }
  0x31   :  { %781 = vmatpush.bf16.msra.mxu3 %v2023_v0  ;;  %743 = vmatmul.bf16.vlgmr.msra.gmra.mxu0 %v2040_v32  ;;  %v2071_v15 = vor.u32 %v1747_v53, %v1608_v59  ;;  %v1404_v20 = vld [vmem:[#allocation5 + $0x12c] sm:$0xf0]  ;;  %v1720_v22 = vld [vmem:[#allocation5 + $0x1e4] sm:$0xf]  ;;  %v2074_v41 = vor.u32 %v1672_v2, %v1308_v11  ;;  %v1669_v49 = vld [vmem:[#allocation5 + $0x4c] sm:$0xf] }
  0x32   :  { %787 = vmatpush.bf16.msrb.mxu0 %v2025_v1  ;;  %756 = vmatmul.bf16.vlgmr.msra.gmra.mxu1 %v2046_v36  ;;  %v1500_v23 = vld [vmem:[#allocation5 + $0x1ec] sm:$0xf0]  ;;  %v1744_v27 = vld [vmem:[#allocation5 + $0x2a4] sm:$0xf]  ;;  %v2078_v42 = vor.u32 %v1696_v13, %v1404_v20  ;;  %v1296_v51 = vld [vmem:[#allocation5 + $0x54] sm:$0xf0] }
  0x33   :  { %800 = vmatpush.bf16.msrb.mxu1 %v2027_v4  ;;  %769 = vmatmul.bf16.vlgmr.msra.gmra.mxu2 %v2034_v19  ;;  %2456 = vst [vmem:[#allocation22_spill] sm:$0xff] %v2071_v15  ;;  %v1596_v28 = vld [vmem:[#allocation5 + $0x2ac] sm:$0xf0]  ;;  %v2080_v43 = vor.u32 %v1720_v22, %v1500_v23  ;;  %v1693_v52 = vld [vmem:[#allocation5 + $0x10c] sm:$0xf]  ;;  %v2086_v0 = vor.u32 %v1669_v49, %v1296_v51 }
  0x34   :  { %813 = vmatpush.bf16.msrb.mxu2 %v2029_v10  ;;  %782 = vmatmul.bf16.vlgmr.msra.gmra.mxu3 %v2038_v26  ;;  %2457 = vst [vmem:[#allocation23_spill] sm:$0xff] %v2074_v41  ;;  %v2083_v53 = vor.u32 %v1744_v27, %v1596_v28  ;;  %v1392_v59 = vld [vmem:[#allocation5 + $0x114] sm:$0xf0]  ;;  %v1741_v2 = vld [vmem:[#allocation5 + $0x28c] sm:$0xf] }
  0x35   :  { %826 = vmatpush.bf16.msrb.mxu3 %v2032_v18  ;;  %2458 = vst [vmem:[#allocation24_spill] sm:$0xff] %v2080_v43  ;;  %v1488_v18 = vld [vmem:[#allocation5 + $0x1d4] sm:$0xf0]  ;;  %v2090_v13 = vor.u32 %v1693_v52, %v1392_v59  ;;  %v1666_v22 = vld [vmem:[#allocation5 + $0x34] sm:$0xf] }
  0x36   :  { %788 = vmatpush.bf16.msrb.mxu0 %v2044_v35  ;;  %2459 = vst [vmem:[#allocation25_spill] sm:$0xff] %v2083_v53  ;;  %v1584_v11 = vld [vmem:[#allocation5 + $0x294] sm:$0xf0]  ;;  %v1284_v23 = vld [vmem:[#allocation5 + $0x3c] sm:$0xf0] }
  0x37   :  { %801 = vmatpush.bf16.msrb.mxu1 %v2050_v39  ;;  %2460 = vst [vmem:[#allocation26_spill] sm:$0xff] %v2086_v0  ;;  %v1690_v27 = vld [vmem:[#allocation5 + $0xf4] sm:$0xf]  ;;  %v2095_v28 = vor.u32 %v1741_v2, %v1584_v11  ;;  %v1476_v14 = vld [vmem:[#allocation5 + $0x1bc] sm:$0xf0]  ;;  %v2098_v62 = vor.u32 %v1666_v22, %v1284_v23 }
  0x38   :  { %814 = vmatpush.bf16.msrb.mxu2 %v2052_v40  ;;  %2461 = vst [vmem:[#allocation27_spill] sm:$0xff] %v2090_v13  ;;  %v1714_v37 = vld [vmem:[#allocation5 + $0x1b4] sm:$0xf]  ;;  %v1572_v51 = vld [vmem:[#allocation5 + $0x27c] sm:$0xf0] }
  0x39   :  { %827 = vmatpush.bf16.msrb.mxu3 %v2056_v47  ;;  %v1717_v47 = vld [vmem:[#allocation5 + $0x1cc] sm:$0xf]  ;;  %2463 = vst [vmem:[#allocation29_spill] sm:$0xff] %v2095_v28  ;;  %v1738_v49 = vld [vmem:[#allocation5 + $0x274] sm:$0xf] }
  0x3a   :  { %789 = vmatpush.bf16.msrb.mxu0 %v2062_v60  ;;  %v2092_v20 = vor.u32 %v1717_v47, %v1488_v18  ;;  %2464 = vst [vmem:[#allocation30_spill] sm:$0xff] %v2098_v62  ;;  %v2104_v47 = vor.u32 %v1714_v37, %v1476_v14  ;;  %v1663_v52 = vld [vmem:[#allocation5 + $0x1c] sm:$0xf]  ;;  %v1272_v59 = vld [vmem:[#allocation5 + $0x24] sm:$0xf0]  ;;  %v2107_v11 = vor.u32 %v1738_v49, %v1572_v51 }
  0x3b   :  { %802 = vmatpush.bf16.msrb.mxu1 %v2066_v61  ;;  %v1687_v2 = vld [vmem:[#allocation5 + $0xdc] sm:$0xf]  ;;  %v1464_v38 = vld [vmem:[#allocation5 + $0x1a4] sm:$0xf0]  ;;  %v2110_v25 = vor.u32 %v1663_v52, %v1272_v59  ;;  %v1684_v49 = vld [vmem:[#allocation5 + $0xc4] sm:$0xf] }
  0x3c   :  { %815 = vmatpush.bf16.msrb.mxu2 %v2068_v63  ;;  %2462 = vst [vmem:[#allocation28_spill] sm:$0xff] %v2092_v20  ;;  %v1711_v50 = vld [vmem:[#allocation5 + $0x19c] sm:$0xf]  ;;  %v1560_v23 = vld [vmem:[#allocation5 + $0x264] sm:$0xf0] }
  0x3d   :  { %828 = vmatpush.bf16.msrb.mxu3 %v2071_v15  ;;  %v1380_v15 = vld [vmem:[#allocation5 + $0xfc] sm:$0xf0]  ;;  %2466 = vst [vmem:[#allocation32_spill] sm:$0xff] %v2104_v47  ;;  %v1735_v22 = vld [vmem:[#allocation5 + $0x25c] sm:$0xf]  ;;  %v2116_v37 = vor.u32 %v1711_v50, %v1464_v38 }
  0x3e   :  { %790 = vmatpush.bf16.msrb.mxu0 %v2074_v41  ;;  %v2102_v18 = vor.u32 %v1690_v27, %v1380_v15  ;;  %2467 = vst [vmem:[#allocation33_spill] sm:$0xff] %v2107_v11  ;;  %v1660_v15 = vld [vmem:[#allocation5 + $0x4] sm:$0xf]  ;;  %v1260_v27 = vld [vmem:[#allocation5 + $0xc] sm:$0xf0]  ;;  %v2119_v12 = vor.u32 %v1735_v22, %v1560_v23 }
  0x3f   :  { %803 = vmatpush.bf16.msrb.mxu1 %v2078_v42  ;;  %2468 = vst [vmem:[#allocation34_spill] sm:$0xff] %v2110_v25  ;;  %v1356_v51 = vld [vmem:[#allocation5 + $0xcc] sm:$0xf0]  ;;  %v1732_v52 = vld [vmem:[#allocation5 + $0x244] sm:$0xf] }
  0x40   :  { %816 = vmatpush.bf16.msrb.mxu2 %v2080_v43  ;;  %2465 = vst [vmem:[#allocation31_spill] sm:$0xff] %v2102_v18  ;;  %v1548_v59 = vld [vmem:[#allocation5 + $0x24c] sm:$0xf0]  ;;  %v1731_v50 = vld [vmem:[#allocation5 + $0x238] sm:$0xf0] }
  0x41   :  { %829 = vmatpush.bf16.msrb.mxu3 %v2083_v53  ;;  %v1368_v53 = vld [vmem:[#allocation5 + $0xe4] sm:$0xf0]  ;;  %2470 = vst [vmem:[#allocation36_spill] sm:$0xff] %v2119_v12  ;;  %v1542_v38 = vld [vmem:[#allocation5 + $0x230] sm:$0xf] }
  0x42   :  { %791 = vmatpush.bf16.msrb.mxu0 %v2086_v0  ;;  %v2114_v14 = vor.u32 %v1687_v2, %v1368_v53  ;;  %v1350_v0 = vld [vmem:[#allocation5 + $0xb0] sm:$0xf]  ;;  %v1707_v53 = vld [vmem:[#allocation5 + $0x178] sm:$0xf0]  ;;  %v2126_v2 = vor.u32 %v1684_v49, %v1356_v51  ;;  %v1338_v41 = vld [vmem:[#allocation5 + $0x98] sm:$0xf] }
  0x43   :  { %804 = vmatpush.bf16.msrb.mxu1 %v2090_v13  ;;  %v1446_v13 = vld [vmem:[#allocation5 + $0x170] sm:$0xf]  ;;  %v1434_v43 = vld [vmem:[#allocation5 + $0x158] sm:$0xf]  ;;  %v1728_v51 = vld [vmem:[#allocation5 + $0x220] sm:$0xf0] }
  0x44   :  { %817 = vmatpush.bf16.msrb.mxu2 %v2092_v20  ;;  %2469 = vst [vmem:[#allocation35_spill] sm:$0xff] %v2114_v14  ;;  %v1683_v20 = vld [vmem:[#allocation5 + $0xb8] sm:$0xf0]  ;;  %v1638_v23 = vld [vmem:[#allocation5 + $0x2f0] sm:$0xf] }
  0x45   :  { %830 = vmatpush.bf16.msrb.mxu3 %v2095_v28  ;;  %v1708_v28 = vld [vmem:[#allocation5 + $0x184] sm:$0xf] }
  0x46   :  { %792 = vmatpush.bf16.msrb.mxu0 %v2098_v62  ;;  %v1452_v62 = vld [vmem:[#allocation5 + $0x18c] sm:$0xf0] }
  0x47   :  { %805 = vmatpush.bf16.msrb.mxu1 %v2102_v18  ;;  %v2128_v22 = vor.u32 %v1708_v28, %v1452_v62  ;;  %v2131_v18 = vor.u32 %v1732_v52, %v1548_v59  ;;  %v1704_v62 = vld [vmem:[#allocation5 + $0x160] sm:$0xf0]  ;;  %v1530_v28 = vld [vmem:[#allocation5 + $0x218] sm:$0xf]  ;;  %v1326_v52 = vld [vmem:[#allocation5 + $0x80] sm:$0xf] }
  0x48   :  { %818 = vmatpush.bf16.msrb.mxu2 %v2104_v47  ;;  %v2122_v47 = vor.u32 %v1660_v15, %v1260_v27  ;;  %v2135_v15 = vor.u32 %v1707_v53, %v1446_v13  ;;  %v2137_v27 = vor.u32 %v1731_v50, %v1542_v38  ;;  %v1677_v59 = vld [vmem:[#allocation5 + $0x88] sm:$0xf0]  ;;  %v2152_v53 = vor.u32 %v1728_v51, %v1530_v28  ;;  %v1422_v38 = vld [vmem:[#allocation5 + $0x140] sm:$0xf]  ;;  %v1314_v51 = vld [vmem:[#allocation5 + $0x68] sm:$0xf] }
  0x49   :  { %831 = vmatpush.bf16.msrb.mxu3 %v2107_v11  ;;  %v1755_v11 = vld [vmem:[#allocation5 + $0x2f8] sm:$0xf0]  ;;  %2471 = vst [vmem:[#allocation37_spill] sm:$0xff] %v2131_v18  ;;  %v1701_v50 = vld [vmem:[#allocation5 + $0x148] sm:$0xf0] }
  0x4a   :  { %793 = vmatpush.bf16.msrb.mxu0 %v2110_v25  ;;  %v2133_v25 = vor.u32 %v1683_v20, %v1350_v0  ;;  %2473 = vst [vmem:[#allocation39_spill] sm:$0xff] %v2137_v27  ;;  %v2140_v49 = vor.u32 %v1755_v11, %v1638_v23  ;;  %v1626_v0 = vld [vmem:[#allocation5 + $0x2d8] sm:$0xf]  ;;  %v1752_v20 = vld [vmem:[#allocation5 + $0x2e0] sm:$0xf0]  ;;  %v2150_v11 = vor.u32 %v1704_v62, %v1434_v43 }
  0x4b   :  { %806 = vmatpush.bf16.msrb.mxu1 %v2114_v14  ;;  %v1680_v14 = vld [vmem:[#allocation5 + $0xa0] sm:$0xf0]  ;;  %2477 = vst [vmem:[#allocation43_spill] sm:$0xff] %v2152_v53  ;;  %v2156_v23 = vor.u32 %v1752_v20, %v1626_v0  ;;  %v2162_v43 = vor.u32 %v1677_v59, %v1326_v52  ;;  %v2166_v62 = vor.u32 %v1701_v50, %v1422_v38  ;;  %v1674_v0 = vld [vmem:[#allocation5 + $0x70] sm:$0xf0] }
  0x4c   :  { %819 = vmatpush.bf16.msrb.mxu2 %v2116_v37  ;;  %2472 = vst [vmem:[#allocation38_spill] sm:$0xff] %v2133_v25  ;;  %v2146_v13 = vor.u32 %v1680_v14, %v1338_v41  ;;  %v1518_v41 = vld [vmem:[#allocation5 + $0x200] sm:$0xf]  ;;  %v1725_v14 = vld [vmem:[#allocation5 + $0x208] sm:$0xf0] }
  0x4d   :  { %832 = vmatpush.bf16.msrb.mxu3 %v2119_v12  ;;  %2474 = vst [vmem:[#allocation40_spill] sm:$0xff] %v2140_v49  ;;  %v1749_v12 = vld [vmem:[#allocation5 + $0x2c8] sm:$0xf0]  ;;  %v2168_v28 = vor.u32 %v1725_v14, %v1518_v41  ;;  %v1410_v20 = vld [vmem:[#allocation5 + $0x128] sm:$0xf] }
  0x4e   :  { %794 = vmatpush.bf16.msrb.mxu0 %v2122_v47  ;;  %2475 = vst [vmem:[#allocation41_spill] sm:$0xff] %v2146_v13  ;;  %v1602_v52 = vld [vmem:[#allocation5 + $0x2a8] sm:$0xf]  ;;  %v1746_v59 = vld [vmem:[#allocation5 + $0x2b0] sm:$0xf0] }
  0x4f   :  { %807 = vmatpush.bf16.msrb.mxu1 %v2126_v2  ;;  %2476 = vst [vmem:[#allocation42_spill] sm:$0xff] %v2150_v11  ;;  %v1302_v41 = vld [vmem:[#allocation5 + $0x50] sm:$0xf]  ;;  %v2183_v14 = vor.u32 %v1746_v59, %v1602_v52  ;;  %v1386_v52 = vld [vmem:[#allocation5 + $0xf8] sm:$0xf] }
  0x50   :  { %820 = vmatpush.bf16.msrb.mxu2 %v2128_v22  ;;  %2478 = vst [vmem:[#allocation44_spill] sm:$0xff] %v2156_v23 }
  0x51   :  { %833 = vmatpush.bf16.msrb.mxu3 %v2131_v18  ;;  %795 = vmatmul.bf16.vlgmr.msrb.gmra.mxu0 %v2040_v32  ;;  %v1614_v18 = vld [vmem:[#allocation5 + $0x2c0] sm:$0xf]  ;;  %2479 = vst [vmem:[#allocation45_spill] sm:$0xff] %v2162_v43 }
  0x52   :  { %839 = vmatpush.bf16.msra.mxu0 %v2133_v25  ;;  %808 = vmatmul.bf16.vlgmr.msrb.gmra.mxu1 %v2046_v36  ;;  %2480 = vst [vmem:[#allocation46_spill] sm:$0xff] %v2166_v62  ;;  %v1506_v25 = vld [vmem:[#allocation5 + $0x1e8] sm:$0xf] }
  0x53   :  { %852 = vmatpush.bf16.msra.mxu1 %v2135_v15  ;;  %821 = vmatmul.bf16.vlgmr.msrb.gmra.mxu2 %v2034_v19  ;;  %2481 = vst [vmem:[#allocation47_spill] sm:$0xff] %v2168_v28 }
  0x54   :  { %865 = vmatpush.bf16.msra.mxu2 %v2137_v27  ;;  %834 = vmatmul.bf16.vlgmr.msrb.gmra.mxu3 %v2038_v26  ;;  %v1722_v27 = vld [vmem:[#allocation5 + $0x1f0] sm:$0xf0]  ;;  %2486 = vst [vmem:[#allocation52_spill] sm:$0xff] %v2183_v14 }
  0x55   :  { %878 = vmatpush.bf16.msra.mxu3 %v2140_v49  ;;  %v2171_v49 = vor.u32 %v1749_v12, %v1614_v18  ;;  %v2180_v50 = vor.u32 %v1722_v27, %v1506_v25  ;;  %v1671_v12 = vld [vmem:[#allocation5 + $0x58] sm:$0xf0]  ;;  %v1398_v18 = vld [vmem:[#allocation5 + $0x110] sm:$0xf] }
  0x56   :  { %840 = vmatpush.bf16.msra.mxu0 %v2146_v13  ;;  %v1698_v13 = vld [vmem:[#allocation5 + $0x130] sm:$0xf0] }
  0x57   :  { %853 = vmatpush.bf16.msra.mxu1 %v2150_v11  ;;  %2482 = vst [vmem:[#allocation48_spill] sm:$0xff] %v2171_v49  ;;  %v2174_v11 = vor.u32 %v1674_v0, %v1314_v51  ;;  %v2178_v38 = vor.u32 %v1698_v13, %v1410_v20  ;;  %v1590_v51 = vld [vmem:[#allocation5 + $0x290] sm:$0xf]  ;;  %v1743_v0 = vld [vmem:[#allocation5 + $0x298] sm:$0xf0] }
  0x58   :  { %866 = vmatpush.bf16.msra.mxu2 %v2152_v53  ;;  %2485 = vst [vmem:[#allocation51_spill] sm:$0xff] %v2180_v50  ;;  %v1494_v53 = vld [vmem:[#allocation5 + $0x1d0] sm:$0xf]  ;;  %v1290_v13 = vld [vmem:[#allocation5 + $0x38] sm:$0xf]  ;;  %v2195_v59 = vor.u32 %v1743_v0, %v1590_v51 }
  0x59   :  { %879 = vmatpush.bf16.msra.mxu3 %v2156_v23  ;;  %2483 = vst [vmem:[#allocation49_spill] sm:$0xff] %v2174_v11  ;;  %v1695_v23 = vld [vmem:[#allocation5 + $0x118] sm:$0xf0]  ;;  %v1668_v20 = vld [vmem:[#allocation5 + $0x40] sm:$0xf0] }
  0x5a   :  { %841 = vmatpush.bf16.msra.mxu0 %v2162_v43  ;;  %2484 = vst [vmem:[#allocation50_spill] sm:$0xff] %v2178_v38  ;;  %v1719_v43 = vld [vmem:[#allocation5 + $0x1d8] sm:$0xf0]  ;;  %v2190_v25 = vor.u32 %v1695_v23, %v1398_v18  ;;  %v1665_v18 = vld [vmem:[#allocation5 + $0x28] sm:$0xf0] }
  0x5b   :  { %854 = vmatpush.bf16.msra.mxu1 %v2166_v62  ;;  %v2186_v62 = vor.u32 %v1671_v12, %v1302_v41  ;;  %v2192_v27 = vor.u32 %v1719_v43, %v1494_v53  ;;  %2490 = vst [vmem:[#allocation56_spill] sm:$0xff] %v2195_v59  ;;  %v1578_v41 = vld [vmem:[#allocation5 + $0x278] sm:$0xf]  ;;  %v1740_v12 = vld [vmem:[#allocation5 + $0x280] sm:$0xf0] }
  0x5c   :  { %867 = vmatpush.bf16.msra.mxu2 %v2168_v28  ;;  %2488 = vst [vmem:[#allocation54_spill] sm:$0xff] %v2190_v25  ;;  %v1482_v28 = vld [vmem:[#allocation5 + $0x1b8] sm:$0xf]  ;;  %v1278_v43 = vld [vmem:[#allocation5 + $0x20] sm:$0xf]  ;;  %v2207_v0 = vor.u32 %v1740_v12, %v1578_v41 }
  0x5d   :  { %880 = vmatpush.bf16.msra.mxu3 %v2171_v49  ;;  %2487 = vst [vmem:[#allocation53_spill] sm:$0xff] %v2186_v62  ;;  %v1692_v49 = vld [vmem:[#allocation5 + $0x100] sm:$0xf0]  ;;  %v1374_v51 = vld [vmem:[#allocation5 + $0xe0] sm:$0xf] }
  0x5e   :  { %842 = vmatpush.bf16.msra.mxu0 %v2174_v11  ;;  %2489 = vst [vmem:[#allocation55_spill] sm:$0xff] %v2192_v27  ;;  %v1716_v11 = vld [vmem:[#allocation5 + $0x1c0] sm:$0xf0]  ;;  %v2202_v53 = vor.u32 %v1692_v49, %v1386_v52  ;;  %v1662_v52 = vld [vmem:[#allocation5 + $0x10] sm:$0xf0] }
  0x5f   :  { %855 = vmatpush.bf16.msra.mxu1 %v2178_v38  ;;  %v2198_v38 = vor.u32 %v1668_v20, %v1290_v13  ;;  %v2204_v23 = vor.u32 %v1716_v11, %v1482_v28  ;;  %v1566_v13 = vld [vmem:[#allocation5 + $0x260] sm:$0xf]  ;;  %v1737_v20 = vld [vmem:[#allocation5 + $0x268] sm:$0xf0]  ;;  %v1266_v28 = vld [vmem:[#allocation5 + $0x8] sm:$0xf] }
  0x60   :  { %868 = vmatpush.bf16.msra.mxu2 %v2180_v50  ;;  %2492 = vst [vmem:[#allocation58_spill] sm:$0xff] %v2202_v53  ;;  %v1470_v50 = vld [vmem:[#allocation5 + $0x1a0] sm:$0xf]  ;;  %v1362_v41 = vld [vmem:[#allocation5 + $0xc8] sm:$0xf]  ;;  %v2219_v12 = vor.u32 %v1737_v20, %v1566_v13 }
  0x61   :  { %881 = vmatpush.bf16.msra.mxu3 %v2183_v14  ;;  %2491 = vst [vmem:[#allocation57_spill] sm:$0xff] %v2198_v38  ;;  %v1689_v14 = vld [vmem:[#allocation5 + $0xe8] sm:$0xf0]  ;;  %v2304_v13 = vld [vmem:[#allocation7] sm:$0xff] }
  0x62   :  { %843 = vmatpush.bf16.msra.mxu0 %v2186_v62  ;;  %v1713_v62 = vld [vmem:[#allocation5 + $0x1a8] sm:$0xf0]  ;;  %v2214_v49 = vor.u32 %v1689_v14, %v1374_v51 }
  0x63   :  { %856 = vmatpush.bf16.msra.mxu1 %v2190_v25  ;;  %v2210_v25 = vor.u32 %v1665_v18, %v1278_v43  ;;  %v2216_v11 = vor.u32 %v1713_v62, %v1470_v50  ;;  %v1554_v43 = vld [vmem:[#allocation5 + $0x248] sm:$0xf]  ;;  %v1734_v18 = vld [vmem:[#allocation5 + $0x250] sm:$0xf0] }
  0x64   :  { %869 = vmatpush.bf16.msra.mxu2 %v2192_v27  ;;  %v1458_v27 = vld [vmem:[#allocation5 + $0x188] sm:$0xf]  ;;  %v2231_v14 = vor.u32 %v1734_v18, %v1554_v43  ;;  %v2508_v18 = vld [vmem:[#allocation17_spill] sm:$0xff] }
  0x65   :  { %882 = vmatpush.bf16.msra.mxu3 %v2195_v59  ;;  %v1686_v59 = vld [vmem:[#allocation5 + $0xd0] sm:$0xf0]  ;;  %v2301_v51 = vld [vmem:[#allocation7 + $0x8] sm:$0xff] }
  0x66   :  { %844 = vmatpush.bf16.msra.mxu0 %v2198_v38  ;;  %v1710_v38 = vld [vmem:[#allocation5 + $0x190] sm:$0xf0]  ;;  %v2226_v62 = vor.u32 %v1686_v59, %v1362_v41  ;;  %v2503_v20 = vld [vmem:[#allocation12_spill] sm:$0xff]  ;;  %v2506_v41 = vld [vmem:[#allocation15_spill] sm:$0xff] }
  0x67   :  { %857 = vmatpush.bf16.msra.mxu1 %v2202_v53  ;;  %v2222_v53 = vor.u32 %v1662_v52, %v1266_v28  ;;  %v2228_v50 = vor.u32 %v1710_v38, %v1458_v27  ;;  %v2295_v27 = vld [vmem:[#allocation7 + $0x18] sm:$0xff]  ;;  %v2298_v59 = vld [vmem:[#allocation7 + $0x10] sm:$0xff]  ;;  %v2507_v43 = vld [vmem:[#allocation16_spill] sm:$0xff] }
  0x68   :  { %870 = vmatpush.bf16.msra.mxu2 %v2204_v23  ;;  %v2504_v28 = vld [vmem:[#allocation13_spill] sm:$0xff]  ;;  %v2505_v52 = vld [vmem:[#allocation14_spill] sm:$0xff] }
  0x69   :  { %883 = vmatpush.bf16.msra.mxu3 %v2207_v0 }
  0x6a   :  { %845 = vmatpush.bf16.msra.mxu0 %v2210_v25 }
  0x6b   :  { %858 = vmatpush.bf16.msra.mxu1 %v2214_v49 }
  0x6c   :  { %871 = vmatpush.bf16.msra.mxu2 %v2216_v11 }
  0x6d   :  { %884 = vmatpush.bf16.msra.mxu3 %v2219_v12 }
  0x6e   :  { %846 = vmatpush.bf16.msra.mxu0 %v2222_v53 }
  0x6f   :  { %859 = vmatpush.bf16.msra.mxu1 %v2226_v62 }
  0x70   :  { %872 = vmatpush.bf16.msra.mxu2 %v2228_v50 }
  0x71   :  { %885 = vmatpush.bf16.msra.mxu3 %v2231_v14  ;;  %847 = vmatmul.bf16.vlgmr.msra.gmra.mxu0 %v2040_v32 }
  0x72   :  { %860 = vmatmul.bf16.vlgmr.msra.gmra.mxu1 %v2046_v36  ;;  %949 = vmatpush.bf16.msrb.mxu0 %v2295_v27 }
  0x73   :  { %873 = vmatmul.bf16.vlgmr.msra.gmra.mxu2 %v2034_v19  ;;  %1007 = vmatpush.bf16.msrb.mxu1 %v1933_v3  ;;  %v2493_v3 = vld [vmem:[#allocation24_spill] sm:$0xff] }
  0x74   :  { %1020 = vmatpush.bf16.msrb.mxu2 %v1935_v7  ;;  %886 = vmatmul.bf16.vlgmr.msra.gmra.mxu3 %v2038_v26  ;;  %v2494_v7 = vld [vmem:[#allocation23_spill] sm:$0xff] }
  0x75   :  { %1033 = vmatpush.bf16.msrb.mxu3 %v1937_v8  ;;  %v2495_v8 = vld [vmem:[#allocation27_spill] sm:$0xff] }
  0x76   :  { %950 = vmatpush.bf16.msrb.mxu0 %v2298_v59 }
  0x77   :  { %1008 = vmatpush.bf16.msrb.mxu1 %v1944_v16  ;;  %v2496_v16 = vld [vmem:[#allocation28_spill] sm:$0xff] }
  0x78   :  { %1021 = vmatpush.bf16.msrb.mxu2 %v1946_v17  ;;  %v2497_v17 = vld [vmem:[#allocation26_spill] sm:$0xff] }
  0x79   :  { %1034 = vmatpush.bf16.msrb.mxu3 %v1949_v21  ;;  %v2498_v21 = vld [vmem:[#allocation31_spill] sm:$0xff] }
  0x7a   :  { %951 = vmatpush.bf16.msrb.mxu0 %v2301_v51 }
  0x7b   :  { %1009 = vmatpush.bf16.msrb.mxu1 %v1954_v29  ;;  %v2499_v29 = vld [vmem:[#allocation32_spill] sm:$0xff] }
  0x7c   :  { %1022 = vmatpush.bf16.msrb.mxu2 %v1958_v33  ;;  %v2500_v33 = vld [vmem:[#allocation30_spill] sm:$0xff] }
  0x7d   :  { %1035 = vmatpush.bf16.msrb.mxu3 %v1960_v34  ;;  %v2501_v34 = vld [vmem:[#allocation35_spill] sm:$0xff] }
  0x7e   :  { %952 = vmatpush.bf16.msrb.mxu0 %v2304_v13 }
  0x7f   :  { %1010 = vmatpush.bf16.msrb.mxu1 %v1966_v44  ;;  %v2502_v44 = vld [vmem:[#allocation34_spill] sm:$0xff] }
  0x80   :  { %1023 = vmatpush.bf16.msrb.mxu2 %v1970_v45 }
  0x81   :  { %1036 = vmatpush.bf16.msrb.mxu3 %v1972_v46 }
  0x82   :  { %1046 = vmatpush.bf16.msra.mxu0 %v2503_v20 }
  0x83   :  { %1011 = vmatpush.bf16.msrb.mxu1 %v1978_v56 }
  0x84   :  { %1024 = vmatpush.bf16.msrb.mxu2 %v1982_v57 }
  0x85   :  { %1037 = vmatpush.bf16.msrb.mxu3 %v1984_v58 }
  0x86   :  { %1047 = vmatpush.bf16.msra.mxu0 %v2504_v28 }
  0x87   :  { %1012 = vmatpush.bf16.msrb.mxu1 %v1990_v5 }
  0x88   :  { %1025 = vmatpush.bf16.msrb.mxu2 %v1994_v6 }
  0x89   :  { %1038 = vmatpush.bf16.msrb.mxu3 %v1996_v9 }
  0x8a   :  { %1048 = vmatpush.bf16.msra.mxu0 %v2505_v52 }
  0x8b   :  { %1013 = vmatpush.bf16.msrb.mxu1 %v2002_v24 }
  0x8c   :  { %1026 = vmatpush.bf16.msrb.mxu2 %v2006_v30 }
  0x8d   :  { %1039 = vmatpush.bf16.msrb.mxu3 %v2008_v31 }
  0x8e   :  { %1049 = vmatpush.bf16.msra.mxu0 %v2506_v41 }
  0x8f   :  { %1014 = vmatpush.bf16.msrb.mxu1 %v2014_v48 }
  0x90   :  { %1027 = vmatpush.bf16.msrb.mxu2 %v2018_v54 }
  0x91   :  { %1040 = vmatpush.bf16.msrb.mxu3 %v2020_v55 }
  0x92   :  { %1050 = vmatpush.bf16.msra.mxu0 %v2507_v43  ;;  %v2374_v43 = vld [vmem:[%s2397_s4] ss:$0 sm:$0xff]  ;;  %s1891_s4 = smov [#allocation8]  }
  0x93   :  { %1059 = vmatpush.bf16.msra.mxu1 %v2025_v1  ;;  %s1243_s14 = sshll.u32 %s1891_s4, 4  ;;  %s1244_s14 = int_to_ptr.vmem [resolvable:$true] %s1243_s14 }
  0x94   :  { %1072 = vmatpush.bf16.msra.mxu2 %v2027_v4 }
  0x95   :  { %1085 = vmatpush.bf16.msra.mxu3 %v2029_v10 }
  0x96   :  { %1051 = vmatpush.bf16.msra.mxu0 %v2508_v18 }
  0x97   :  { %1060 = vmatpush.bf16.msra.mxu1 %v2044_v35 }
  0x98   :  { %1073 = vmatpush.bf16.msra.mxu2 %v2050_v39 }
  0x99   :  { %1086 = vmatpush.bf16.msra.mxu3 %v2052_v40 }
  0x9b   :  { %1061 = vmatpush.bf16.msra.mxu1 %v2062_v60 }
  0x9c   :  { %1074 = vmatpush.bf16.msra.mxu2 %v2066_v61 }
  0x9d   :  { %1087 = vmatpush.bf16.msra.mxu3 %v2068_v63 }
  0x9f   :  { %1062 = vmatpush.bf16.msra.mxu1 %v2494_v7  ;;  %v2510_v7 = vld [vmem:[#allocation19_spill] sm:$0xff] }
  0xa0   :  { %1075 = vmatpush.bf16.msra.mxu2 %v2078_v42 }
  0xa1   :  { %1088 = vmatpush.bf16.msra.mxu3 %v2493_v3  ;;  %v2509_v3 = vld [vmem:[#allocation18_spill] sm:$0xff] }
  0xa2   :  { %1052 = vmatpush.bf16.msra.mxu0 %v2509_v3 }
  0xa3   :  { %1063 = vmatpush.bf16.msra.mxu1 %v2497_v17  ;;  %v992_v17 = vld [vmem:[#allocation2 + $0x18] sm:$0xff] }
  0xa4   :  { %1076 = vmatpush.bf16.msra.mxu2 %v2495_v8  ;;  %v991_v8 = vld [vmem:[#allocation2 + $0x10] sm:$0xff] }
  0xa5   :  { %1089 = vmatpush.bf16.msra.mxu3 %v2496_v16  ;;  %v996_v16 = vunpack.c.h.b16 %v991_v8 }
  0xa6   :  { %1053 = vmatpush.bf16.msra.mxu0 %v2510_v7 }
  0xa7   :  { %1064 = vmatpush.bf16.msra.mxu1 %v2500_v33 }
  0xa8   :  { %1077 = vmatpush.bf16.msra.mxu2 %v2498_v21  ;;  %v1000_v21 = vpack.c.b16 %v996_v16, %v996_v16 }
  0xa9   :  { %1090 = vmatpush.bf16.msra.mxu3 %v2499_v29  ;;  %v997_v29 = vunpack.c.l.b16 %v992_v17 }
  0xaa   :  { %1028 = vmatmul.bf16.vlgmr.msrb.gmra.mxu2 %v1000_v21 }
  0xab   :  { %1065 = vmatpush.bf16.msra.mxu1 %v2502_v44  ;;  %v995_v44 = vunpack.c.l.b16 %v991_v8 }
  0xac   :  { %1078 = vmatpush.bf16.msra.mxu2 %v2501_v34  ;;  %v1001_v34 = vpack.c.b16 %v997_v29, %v997_v29 }
  0xad   :  { %1091 = vmatpush.bf16.msra.mxu3 %v2116_v37 }
  0xae   :  { %v744_v45 = vpop.f32.mrf.mxu0  ;;  %1041 = vmatmul.bf16.vlgmr.msrb.gmra.mxu3 %v1001_v34 }
  0xaf   :  { %1066 = vmatpush.bf16.msra.mxu1 %v2122_v47  ;;  %v757_v46 = vpop.f32.mrf.mxu1 }
  0xb0   :  { %1079 = vmatpush.bf16.msra.mxu2 %v2126_v2  ;;  %v758_v56 = vadd.f32 %v757_v46, %v744_v45  ;;  %v2511_v45 = vld [vmem:[#allocation39_spill] sm:$0xff]  ;;  %v999_v46 = vpack.c.b16 %v995_v44, %v995_v44 }
  0xb1   :  { %1092 = vmatpush.bf16.msra.mxu3 %v2128_v22 }
  0xb2   :  { %1015 = vmatmul.bf16.vlgmr.msrb.gmra.mxu1 %v999_v46 }
  0xb4   :  { %1124 = vmatpush.bf16.msrb.mxu2 %v2135_v15  ;;  %v2516_v15 = vld [vmem:[#allocation41_spill] sm:$0xff] }
  0xb5   :  { %1137 = vmatpush.bf16.msrb.mxu3 %v2511_v45 }
  0xb6   :  { %v770_v57 = vpop.f32.mrf.mxu2  ;;  %v746_v9 = vpop.f32.mrf.mxu0 }
  0xb7   :  { %v771_v58 = vadd.f32 %v770_v57, %v758_v56  ;;  %v783_v5 = vpop.f32.mrf.mxu3  ;;  %v759_v24 = vpop.f32.mrf.mxu1  ;;  %v2512_v57 = vld [vmem:[#allocation42_spill] sm:$0xff] }
  0xb8   :  { %1125 = vmatpush.bf16.msrb.mxu2 %v2512_v57 }
  0xb9   :  { %v2289_v6 = vadd.f32 %v783_v5, %v771_v58  ;;  %v2513_v58 = vld [vmem:[#allocation38_spill] sm:$0xff]  ;;  %v2514_v5 = vld [vmem:[#allocation43_spill] sm:$0xff] }
  0xba   :  { %1111 = vmatpush.bf16.msrb.mxu1 %v2513_v58  ;;  %1138 = vmatpush.bf16.msrb.mxu3 %v2514_v5 }
  0xbb   :  { %892 = vrot.lane.b32.xlu0 %v2289_v6, %s1889_s11  ;;  %1080 = vmatmul.bf16.vlgmr.msra.gmra.mxu2 %v1000_v21 }
  0xbe   :  { %v772_v30 = vpop.f32.mrf.mxu2  ;;  %1112 = vmatpush.bf16.msrb.mxu1 %v2516_v15  ;;  %1093 = vmatmul.bf16.vlgmr.msra.gmra.mxu3 %v1001_v34 }
  0xbf   :  { %v785_v31 = vpop.f32.mrf.mxu3  ;;  %v2515_v30 = vld [vmem:[#allocation46_spill] sm:$0xff] }
  0xc0   :  { %1126 = vmatpush.bf16.msrb.mxu2 %v2515_v30 }
  0xc2   :  { %1067 = vmatmul.bf16.vlgmr.msra.gmra.mxu1 %v999_v46 }
  0xce   :  { %v796_v48 = vpop.f32.mrf.mxu0 }
  0xcf   :  { %v809_v54 = vpop.f32.mrf.mxu1 }
  0xd0   :  { %v810_v55 = vadd.f32 %v809_v54, %v796_v48  ;;  %v2517_v48 = vld [vmem:[#allocation47_spill] sm:$0xff]  ;;  %v2518_v54 = vld [vmem:[#allocation50_spill] sm:$0xff] }
  0xd1   :  { %1139 = vmatpush.bf16.msrb.mxu3 %v2517_v48  ;;  %1127 = vmatpush.bf16.msrb.mxu2 %v2518_v54 }
  0xd6   :  { %v822_v1 = vpop.f32.mrf.mxu2  ;;  %v798_v26 = vpop.f32.mrf.mxu0 }
  0xd7   :  { %v823_v4 = vadd.f32 %v822_v1, %v810_v55  ;;  %v835_v10 = vpop.f32.mrf.mxu3  ;;  %v811_v32 = vpop.f32.mrf.mxu1  ;;  %v2519_v1 = vld [vmem:[#allocation45_spill] sm:$0xff]  ;;  %v2521_v26 = vld [vmem:[#allocation54_spill] sm:$0xff] }
  0xd8   :  { %1113 = vmatpush.bf16.msrb.mxu1 %v2519_v1  ;;  %1128 = vmatpush.bf16.msrb.mxu2 %v2521_v26 }
  0xd9   :  { %v836_v19 = vadd.f32 %v835_v10, %v823_v4  ;;  %v2520_v4 = vld [vmem:[#allocation51_spill] sm:$0xff] }
  0xda   :  { %1140 = vmatpush.bf16.msrb.mxu3 %v2520_v4 }
  0xdb   :  { %898 = vrot.lane.b32.xlu0 %v836_v19, %s1889_s11 }
  0xde   :  { %v824_v35 = vpop.f32.mrf.mxu2 }
  0xdf   :  { %v837_v36 = vpop.f32.mrf.mxu3  ;;  %v2522_v35 = vld [vmem:[#allocation49_spill] sm:$0xff] }
  0xe0   :  { %1114 = vmatpush.bf16.msrb.mxu1 %v2522_v35  ;;  %v2523_v36 = vld [vmem:[#allocation55_spill] sm:$0xff] }
  0xe1   :  { %1141 = vmatpush.bf16.msrb.mxu3 %v2523_v36 }
  0xe5   :  { %1142 = vmatpush.bf16.msrb.mxu3 %v2204_v23  ;;  %v998_v23 = vunpack.c.h.b16 %v992_v17 }
  0xe9   :  { %1143 = vmatpush.bf16.msrb.mxu3 %v2216_v11  ;;  %v2531_v11 = vld [vmem:[#allocation29_spill] sm:$0xff] }
  0xed   :  { %1144 = vmatpush.bf16.msrb.mxu3 %v2228_v50  ;;  %v2535_v50 = vld [vmem:[#allocation40_spill] sm:$0xff] }
  0xee   :  { %v848_v39 = vpop.f32.mrf.mxu0 }
  0xef   :  { %v861_v40 = vpop.f32.mrf.mxu1 }
  0xf0   :  { %v862_v60 = vadd.f32 %v861_v40, %v848_v39  ;;  %v2524_v40 = vld [vmem:[#allocation58_spill] sm:$0xff]  ;;  %1145 = vmatmul.bf16.vlgmr.msrb.gmra.mxu3 %v1001_v34 }
  0xf1   :  { %1129 = vmatpush.bf16.msrb.mxu2 %v2524_v40 }
  0xf5   :  { %1130 = vmatpush.bf16.msrb.mxu2 %v2214_v49  ;;  %v1002_v49 = vpack.c.b16 %v998_v23, %v998_v23 }
  0xf6   :  { %v874_v61 = vpop.f32.mrf.mxu2  ;;  %v850_v47 = vpop.f32.mrf.mxu0 }
  0xf7   :  { %v875_v63 = vadd.f32 %v874_v61, %v862_v60  ;;  %v887_v42 = vpop.f32.mrf.mxu3  ;;  %v863_v37 = vpop.f32.mrf.mxu1  ;;  %v2525_v61 = vld [vmem:[#allocation53_spill] sm:$0xff] }
  0xf8   :  { %1115 = vmatpush.bf16.msrb.mxu1 %v2525_v61  ;;  %v2528_v47 = vld [vmem:[#allocation21_spill] sm:$0xff]  ;;  %v2529_v37 = vld [vmem:[#allocation22_spill] sm:$0xff] }
  0xf9   :  { %v888_v2 = vadd.f32 %v887_v42, %v875_v63  ;;  %v2526_v63 = vld [vmem:[#allocation20_spill] sm:$0xff]  ;;  %v2527_v42 = vld [vmem:[#allocation57_spill] sm:$0xff]  ;;  %1131 = vmatpush.bf16.msrb.mxu2 %v2226_v62 }
  0xfa   :  { %v2533_v62 = vld [vmem:[#allocation36_spill] sm:$0xff] }
  0xfb   :  { %904 = vrot.lane.b32.xlu1 %v888_v2, %s1889_s11 }
  0xfc   :  { %1116 = vmatpush.bf16.msrb.mxu1 %v2527_v42  ;;  %1132 = vmatmul.bf16.vlgmr.msrb.gmra.mxu2 %v1000_v21 }
  0xfe   :  { %v876_v22 = vpop.f32.mrf.mxu2 }
  0xff   :  { %v889_v38 = vpop.f32.mrf.mxu3  ;;  %v2536_v22 = vld [vmem:[#allocation44_spill] sm:$0xff] }
 0x100   :  { %1117 = vmatpush.bf16.msrb.mxu1 %v2210_v25  ;;  %v2532_v25 = vld [vmem:[#allocation33_spill] sm:$0xff]  ;;  %v2537_v38 = vld [vmem:[#allocation48_spill] sm:$0xff] }
 0x104   :  { %1118 = vmatpush.bf16.msrb.mxu1 %v2222_v53  ;;  %v2534_v53 = vld [vmem:[#allocation37_spill] sm:$0xff] }
 0x107   :  { %1119 = vmatmul.bf16.vlgmr.msrb.gmra.mxu1 %v999_v46 }
 0x108   :  { %1190 = vmatpush.bf16.msra.mxu1 %v2295_v27  ;;  %v2538_v27 = vld [vmem:[#allocation52_spill] sm:$0xff] }
 0x10c   :  { %1191 = vmatpush.bf16.msra.mxu1 %v2298_v59  ;;  %v2539_v59 = vld [vmem:[#allocation56_spill] sm:$0xff] }
 0x110   :  { %1192 = vmatpush.bf16.msra.mxu1 %v2301_v51 }
 0x114   :  { %1193 = vmatpush.bf16.msra.mxu1 %v2304_v13 }
 0x12d   :  { %v893_v33 = vpop.permute.xlu0 %892  ;;  %v1029_v13 = vpop.f32.mrf.mxu2 }
 0x12e   :  { %v895_v56 = vmax.f32 %v2289_v6, %v893_v33  ;;  %v2328_v6 = vld [vmem:[%s2395_s2] ss:$0 sm:$0xff] }
 0x12f   :  { %v1016_v51 = vpop.f32.mrf.mxu1 }
 0x130   :  { %v896_v24 = vmax.f32 %v895_v56, %v836_v19  ;;  %v1030_v29 = vadd.f32 %v1029_v13, %v1016_v51 }
 0x131   :  { %v1042_v20 = vpop.f32.mrf.mxu3 }
 0x132   :  { %v1043_v33 = vadd.f32 %v1042_v20, %v1030_v29 }
 0x135   :  { %v1031_v52 = vpop.f32.mrf.mxu2 }
 0x137   :  { %v1018_v28 = vpop.f32.mrf.mxu1 }
 0x139   :  { %v1044_v41 = vpop.f32.mrf.mxu3 }
 0x13e   :  { %v1081_v3 = vpop.f32.mrf.mxu2 }
 0x13f   :  { %v1068_v18 = vpop.f32.mrf.mxu1 }
 0x141   :  { %v1094_v7 = vpop.f32.mrf.mxu3 }
 0x146   :  { %v1083_v16 = vpop.f32.mrf.mxu2 }
 0x149   :  { %v1096_v17 = vpop.f32.mrf.mxu3 }
 0x14d   :  { %v899_v9 = vpop.permute.xlu0 %898 }
 0x14e   :  { %v901_v31 = vmax.f32 %v896_v24, %v899_v9  ;;  %v1082_v24 = vadd.f32 %v1081_v3, %v1068_v18 }
 0x150   :  { %v902_v55 = vmax.f32 %v901_v31, %v888_v2  ;;  %v2530_v2 = vld [vmem:[#allocation25_spill] sm:$0xff]  ;;  %v1095_v30 = vadd.f32 %v1094_v7, %v1082_v24 }
 0x16d   :  { %v905_v10 = vpop.permute.xlu1 %904 }
 0x16e   :  { %v907_v19 = vmax.f32 %v902_v55, %v905_v10 }
 0x170   :  { %v911_v32 = vadd.f32 %v2328_v6, %v907_v19 }
 0x172   :  { %v2336_v39 = vmax.f32 %v911_v32, 0.0 }
 0x173   :  { %v1146_v45 = vpop.f32.mrf.mxu3 }
 0x174   :  { %v913_v60 = vpack.c.bf16 %v2336_v39, %v2336_v39 }
 0x176   :  { %1656 = vmatmul.msk.bf16.vlgmr.msrb.gmra.mxu0 %vm941_vm0, %v913_v60 }
 0x177   :  { %1098 = vmatpush.bf16.msrb.mxu0 %v2526_v63 }
 0x17b   :  { %1099 = vmatpush.bf16.msrb.mxu0 %v2528_v47  ;;  %v1148_v5 = vpop.f32.mrf.mxu3 }
 0x17f   :  { %1100 = vmatpush.bf16.msrb.mxu0 %v2529_v37  ;;  %v1133_v44 = vpop.f32.mrf.mxu2 }
 0x183   :  { %1101 = vmatpush.bf16.msrb.mxu0 %v2530_v2 }
 0x186   :  { %1054 = vmatmul.bf16.vlgmr.msra.gmra.mxu0 %v1002_v49 }
 0x187   :  { %1102 = vmatpush.bf16.msrb.mxu0 %v2531_v11  ;;  %v1135_v58 = vpop.f32.mrf.mxu2 }
 0x18b   :  { %1103 = vmatpush.bf16.msrb.mxu0 %v2532_v25 }
 0x18f   :  { %1104 = vmatpush.bf16.msrb.mxu0 %v2533_v62 }
 0x193   :  { %1105 = vmatpush.bf16.msrb.mxu0 %v2534_v53 }
 0x196   :  { %1106 = vmatmul.bf16.vlgmr.msrb.gmra.mxu0 %v1002_v49 }
 0x197   :  { %1150 = vmatpush.bf16.msra.mxu0 %v2535_v50 }
 0x19b   :  { %1151 = vmatpush.bf16.msra.mxu0 %v2536_v22 }
 0x19f   :  { %1152 = vmatpush.bf16.msra.mxu0 %v2537_v38 }
 0x1a3   :  { %1153 = vmatpush.bf16.msra.mxu0 %v2538_v27 }
 0x1a7   :  { %1154 = vmatpush.bf16.msra.mxu0 %v2539_v59 }
 0x1ab   :  { %1155 = vmatpush.bf16.msra.mxu0 %v2207_v0 }
 0x1af   :  { %1156 = vmatpush.bf16.msra.mxu0 %v2219_v12 }
 0x1b3   :  { %1157 = vmatpush.bf16.msra.mxu0 %v2231_v14  ;;  %v1070_v14 = vpop.f32.mrf.mxu1 }
 0x1b6   :  { %1158 = vmatmul.bf16.vlgmr.msra.gmra.mxu0 %v1002_v49 }
 0x1bb   :  { %v1120_v34 = vpop.f32.mrf.mxu1 }
 0x1bc   :  { %v1134_v54 = vadd.f32 %v1133_v44, %v1120_v34 }
 0x1be   :  { %v1147_v55 = vadd.f32 %v1146_v45, %v1134_v54 }
 0x1c3   :  { %v1122_v57 = vpop.f32.mrf.mxu1 }
 0x1f3   :  { %v954_v0 = vpop.f32.mrf.mxu0 }
 0x1f4   :  { %v955_v12 = vadd.f32 %v2374_v43, %v954_v0 }
 0x1f6   :  { %v958_v8 = vmax.f32 %v955_v12, 0.0  ;;  %v1657_v19 = vmul.f32 -1.442695, %v955_v12 }
 0x1f8   :  { %979 = vrot.lane.b32.xlu0 %v958_v8, %s1889_s11  ;;  %1772 = vpow2.f32 %v1657_v19 }
 0x1fb   :  { %v956_v21 = vpop.f32.mrf.mxu0 }
 0x1fe   :  { %v1773_v26 = vpop.eup %1772 }
 0x1ff   :  { %v962_v32 = vadd.f32 1.0, %v1773_v26 }
 0x201   :  { %1774 = vrcp.f32 %v962_v32  ;;  %v974_v61 = vand.u32 2147483648, %v962_v32  ;;  %vm968_vm2 = vweird.f32 %v962_v32  ;;  %v972_v63 = vand.u32 2147483647, %v962_v32 }
 0x203   :  { %v1055_v46 = vpop.f32.mrf.mxu0  ;;  %v975_v23 = vor.u32 1.1754944e-38, %v974_v61  ;;  %vm973_vm4 = vcmp.eq.f32.partialorder %v972_v63, 8.507059e+37 }
 0x204   :  { %v1056_v56 = vadd.f32 %v1055_v46, %v1043_v33 }
 0x206   :  { %1164 = vrot.lane.b32.xlu1 %v1056_v56, %s1889_s11 }
 0x207   :  { %v1775_v35 = vpop.eup %1774 }
 0x208   :  { %v964_v36 = vmul.f32 %v1775_v35, %v962_v32  ;;  %vm969_vm1 = vweird.f32 %v1775_v35 }
 0x209   :  { %vm970_vm3 = vmor %vm968_vm2, %vm969_vm1 }
 0x20b   :  { %v1057_v9 = vpop.f32.mrf.mxu0 }
 0x20e   :  { %985 = vrot.lane.b32.xlu1 %v2336_v39, %s1889_s11  ;;  %v965_v39 = vsub.f32 1.0, %v964_v36 }
 0x210   :  { %v966_v40 = vmul.f32 %v1775_v35, %v965_v39 }
 0x212   :  { %v967_v60 = vadd.f32 %v1775_v35, %v966_v40 }
 0x213   :  { %v1107_v31 = vpop.f32.mrf.mxu0 }
 0x214   :  { %v1108_v15 = vadd.f32 %v1107_v31, %v1095_v30  ;;  %v971_v47 = vsel %vm970_vm3, %v1775_v35, %v967_v60 }
 0x215   :  { %v976_v37 = vsel %vm973_vm4, %v975_v23, %v971_v47 }
 0x216   :  { %1170 = vrot.lane.b32.xlu2 %v1108_v15, %s1889_s11  ;;  %v983_v2 = vsub.f32 1.0, %v976_v37 }
 0x21b   :  { %v1109_v48 = vpop.f32.mrf.mxu0 }
 0x233   :  { %v1159_v1 = vpop.f32.mrf.mxu0 }
 0x234   :  { %v1160_v4 = vadd.f32 %v1159_v1, %v1147_v55 }
 0x236   :  { %1176 = vrot.lane.b32.xlu2 %v1160_v4, %s1889_s11 }
 0x23b   :  { %v1161_v10 = vpop.f32.mrf.mxu0 }
 0x26a   :  { %v980_v49 = vpop.permute.xlu0 %979 }
 0x26b   :  { %v982_v62 = vmul.f32 %v980_v49, %v976_v37 }
 0x270   :  { %v1171_v38 = vpop.permute.xlu2 %1170 }
 0x278   :  { %v1165_v42 = vpop.permute.xlu1 %1164 }
 0x279   :  { %v1167_v11 = vmax.f32 %v1056_v56, %v1165_v42 }
 0x27b   :  { %v1168_v22 = vmax.f32 %v1167_v11, %v1108_v15 }
 0x27d   :  { %v1173_v27 = vmax.f32 %v1168_v22, %v1171_v38 }
 0x27f   :  { %v1174_v59 = vmax.f32 %v1173_v27, %v1160_v4 }
 0x280   :  { %v986_v25 = vpop.permute.xlu1 %985 }
 0x281   :  { %v988_v53 = vmul.f32 %v986_v25, %v983_v2 }
 0x283   :  { %v989_v50 = vadd.f32 %v988_v53, %v982_v62 }
 0x285   :  { %1232 = vrot.lane.b32.xlu1 %v989_v50, %s1889_s11 }
 0x290   :  { %v1177_v51 = vpop.permute.xlu2 %1176 }
 0x291   :  { %v1179_v13 = vmax.f32 %v1174_v59, %v1177_v51 }
 0x293   :  { %v1180_v20 = vadd.f32 %v2328_v6, %v1179_v13 }
 0x295   :  { %v1181_v28 = vmax.f32 %v1180_v20, 0.0 }
 0x297   :  { %v1182_v52 = vpack.c.bf16 %v1181_v28, %v1181_v28  ;;  %1226 = vrot.lane.b32.xlu0 %v1181_v28, %s1889_s11 }
 0x299   :  { %1658 = vmatmul.msk.bf16.vlgmr.msra.gmra.mxu1 %vm941_vm0, %v1182_v52 }
 0x2f7   :  { %v1233_v41 = vpop.permute.xlu1 %1232 }
 0x2f8   :  { %1235 = vst.msk [vmem:[#allocation8] sm:$0xff] %vm941_vm0, %v1233_v41 }
 0x309   :  { %v1227_v56 = vpop.permute.xlu0 %1226 }
 0x316   :  { %v1195_v18 = vpop.f32.mrf.mxu1 }
 0x317   :  { %v1196_v3 = vadd.f32 %v2374_v43, %v1195_v18 }
 0x319   :  { %v1199_v7 = vmax.f32 %v1196_v3, 0.0  ;;  %v1659_v12 = vmul.f32 -1.442695, %v1196_v3 }
 0x31b   :  { %1220 = vrot.lane.b32.xlu2 %v1199_v7, %s1889_s11  ;;  %1776 = vpow2.f32 %v1659_v12 }
 0x31e   :  { %v1197_v0 = vpop.f32.mrf.mxu1 }
 0x321   :  { %v1777_v8 = vpop.eup %1776 }
 0x322   :  { %v1203_v6 = vadd.f32 1.0, %v1777_v8 }
 0x324   :  { %1778 = vrcp.f32 %v1203_v6  ;;  %v1215_v33 = vand.u32 2147483648, %v1203_v6  ;;  %vm1209_vm6 = vweird.f32 %v1203_v6  ;;  %v1213_v34 = vand.u32 2147483647, %v1203_v6 }
 0x326   :  { %v1216_v44 = vor.u32 1.1754944e-38, %v1215_v33  ;;  %vm1214_vm8 = vcmp.eq.f32.partialorder %v1213_v34, 8.507059e+37 }
 0x32a   :  { %v1779_v14 = vpop.eup %1778 }
 0x32b   :  { %v1205_v16 = vmul.f32 %v1779_v14, %v1203_v6  ;;  %vm1210_vm5 = vweird.f32 %v1779_v14 }
 0x32c   :  { %vm1211_vm7 = vmor %vm1209_vm6, %vm1210_vm5 }
 0x32d   :  { %v1206_v17 = vsub.f32 1.0, %v1205_v16 }
 0x32f   :  { %v1207_v21 = vmul.f32 %v1779_v14, %v1206_v17 }
 0x331   :  { %v1208_v29 = vadd.f32 %v1779_v14, %v1207_v21 }
 0x333   :  { %v1212_v43 = vsel %vm1211_vm7, %v1779_v14, %v1208_v29 }
 0x334   :  { %v1217_v45 = vsel %vm1214_vm8, %v1216_v44, %v1212_v43 }
 0x335   :  { %v1224_v46 = vsub.f32 1.0, %v1217_v45 }
 0x337   :  { %v1229_v5 = vmul.f32 %v1227_v56, %v1224_v46 }
 0x375   :  { %v1221_v57 = vpop.permute.xlu2 %1220 }
 0x376   :  { %v1223_v58 = vmul.f32 %v1221_v57, %v1217_v45 }
 0x378   :  { %v1230_v9 = vadd.f32 %v1229_v5, %v1223_v58 }
 0x37a   :  { %1237 = vst.msk [vmem:[#allocation8] sm:$0xff] %vm1236_vm9, %v1230_v9 }
 0x37b   :  { %1248 = dma.vmem_to_hbm [thread:$0]  %s1244_s14, 128, %s1246_s17, [#allocation4]  }
 0x37c   :  { %1880 = dma.done.wait [#allocation4], 128  }
 0x37d   :  { %1881 = vsyncadd [#allocation4], 4294967168 }
 0x37e   :  { %1253 = vsyncpa [#allocation3], 1 }
 0x37f   :  { %1254 = vsyncpa [#allocation6], 1 }
 0x380   :  { %1255 = vsyncpa [#allocation4], 1 }

</bundles_post_ra>
